<compile_context>
chip_gen: v7x
topology: tpu7x:2x2x1
jax: 0.10.0
libtpu: 0.0.40
codegen_flags: <defaults>
</compile_context>

<pallas_src>
import functools

import jax
import jax.numpy as jnp
from jax.experimental import pallas as pl
from jax.experimental.pallas import tpu as pltpu


_LANE = 128
_VMEM_LIMIT = 48 * 1024 * 1024          # safe on v5e/v6e (128 MiB) and v7x (64 MiB)
_FUSED_ADJ_BUDGET = 20 * 1024 * 1024    # bf16 adj bytes allowed for the fused path


def _round_up(v, m):
    return (v + m - 1) // m * m


# ---------------------------------------------------------------------------
# Fused path: all layers in ONE pallas_call, adjacency resident in VMEM.
# ---------------------------------------------------------------------------
def _sage_fused_kernel(adj_ref, x_ref, wl_ref, wr_ref, b_ref, o_ref, *,
                       num_layers):
    # adj_ref : [Np, Np] bf16, row-normalized (deg_inv already folded in)
    # x_ref   : [Np, F]  bf16   (F is the lane-dense padded feature width)
    # wl_ref  : [L, F, F] bf16, wr_ref : [L, F, F] bf16, b_ref : [L, 1, F] f32
    x = x_ref[...]
    out = None
    for layer in range(num_layers):
        # mean aggregation over neighbors (normalization baked into adj)
        agg = jnp.dot(adj_ref[...], x, preferred_element_type=jnp.float32)
        # SAGEConv: lin_l(agg) + lin_r(x), bias lives in lin_l
        out = jnp.dot(agg.astype(jnp.bfloat16), wl_ref[layer],
                      preferred_element_type=jnp.float32)
        out = out + jnp.dot(x, wr_ref[layer],
                            preferred_element_type=jnp.float32)
        out = out + b_ref[layer]
        if layer < num_layers - 1:
            out = jnp.maximum(out, 0.0)          # ReLU (hidden layers only)
            x = out.astype(jnp.bfloat16)         # next layer input, stays in VMEM
            # dropout: identity in eval mode
    o_ref[...] = out.astype(o_ref.dtype)


def _sage_forward_fused(adj_norm, x_p, wl, wr, b):
    n_pad, fp = x_p.shape
    num_layers = wl.shape[0]
    full = lambda shape: pl.BlockSpec(shape, lambda: (0,) * len(shape))
    kernel = functools.partial(_sage_fused_kernel, num_layers=num_layers)
    return pl.pallas_call(
        kernel,
        out_shape=jax.ShapeDtypeStruct((n_pad, fp), jnp.float32),
        grid=(),
        in_specs=[
            full((n_pad, n_pad)),            # adj_norm (bf16, resident all layers)
            full((n_pad, fp)),               # x (bf16)
            full((num_layers, fp, fp)),      # W_l stack (bf16)
            full((num_layers, fp, fp)),      # W_r stack (bf16)
            full((num_layers, 1, fp)),       # bias stack (f32)
        ],
        out_specs=full((n_pad, fp)),
        compiler_params=pltpu.CompilerParams(vmem_limit_bytes=_VMEM_LIMIT),
    )(adj_norm, x_p, wl, wr, b)


# ---------------------------------------------------------------------------
# Tiled path: per-layer kernel, grid = (row tiles, K tiles), f32 accumulator.
# ---------------------------------------------------------------------------
def _sage_conv_tiled_kernel(adj_ref, xk_ref, xm_ref, wl_ref, wr_ref, b_ref,
                            o_ref, acc_ref, *, apply_relu):
    k = pl.program_id(1)

    @pl.when(k == 0)
    def _():
        acc_ref[...] = jnp.zeros_like(acc_ref)

    # accumulate adj_norm[row-tile, K-tile] @ x[K-tile, :]
    acc_ref[...] += jnp.dot(adj_ref[...], xk_ref[...],
                            preferred_element_type=jnp.float32)

    @pl.when(k == pl.num_programs(1) - 1)
    def _():
        agg = acc_ref[...].astype(jnp.bfloat16)
        out = jnp.dot(agg, wl_ref[...], preferred_element_type=jnp.float32)
        out = out + jnp.dot(xm_ref[...], wr_ref[...],
                            preferred_element_type=jnp.float32)
        out = out + b_ref[...]
        if apply_relu:
            out = jnp.maximum(out, 0.0)
        o_ref[...] = out.astype(o_ref.dtype)


def _sage_conv_tiled(adj_norm, x, w_l, w_r, b, *, apply_relu, out_dtype, tm, tk):
    n_pad = adj_norm.shape[0]
    fp = w_l.shape[1]
    kernel = functools.partial(_sage_conv_tiled_kernel, apply_relu=apply_relu)
    return pl.pallas_call(
        kernel,
        out_shape=jax.ShapeDtypeStruct((n_pad, fp), out_dtype),
        grid=(n_pad // tm, n_pad // tk),
        in_specs=[
            pl.BlockSpec((tm, tk), lambda i, k: (i, k)),   # adj_norm tile
            pl.BlockSpec((tk, fp), lambda i, k: (k, 0)),   # x, neighbor (K) rows
            pl.BlockSpec((tm, fp), lambda i, k: (i, 0)),   # x, self (row) rows
            pl.BlockSpec((fp, fp), lambda i, k: (0, 0)),   # W_l
            pl.BlockSpec((fp, fp), lambda i, k: (0, 0)),   # W_r
            pl.BlockSpec((1, fp), lambda i, k: (0, 0)),    # bias
        ],
        out_specs=pl.BlockSpec((tm, fp), lambda i, k: (i, 0)),
        scratch_shapes=[pltpu.VMEM((tm, fp), jnp.float32)],
        compiler_params=pltpu.CompilerParams(
            dimension_semantics=("parallel", "arbitrary"),
            vmem_limit_bytes=_VMEM_LIMIT,
        ),
    )(adj_norm, x, x, w_l, w_r, b)


# ---------------------------------------------------------------------------
# Parameters and forward wrapper.
# ---------------------------------------------------------------------------
def init_sage_params(key, in_channels, hidden_channels, out_channels, num_layers):
    dims = [in_channels] + [hidden_channels] * (num_layers - 1) + [out_channels]
    params = []
    for i in range(num_layers):
        f_in, f_out = dims[i], dims[i + 1]
        key, k1, k2 = jax.random.split(key, 3)
        scale = 1.0 / jnp.sqrt(jnp.float32(f_in))
        w_l = jax.random.uniform(k1, (f_in, f_out), jnp.float32, -scale, scale)
        w_r = jax.random.uniform(k2, (f_in, f_out), jnp.float32, -scale, scale)
        b = jnp.zeros((f_out,), jnp.float32)
        params.append((w_l, w_r, b))
    return params


def _pad_params(params, fp):
    # Zero-pad every layer to a uniform lane-dense [fp, fp] so layers can be
    # stacked and the MXU / vector stores run at full width. Zero columns stay
    # zero through bias/ReLU so padding is exact.
    wls, wrs, bs = [], [], []
    for w_l, w_r, b in params:
        f_in, f_out = w_l.shape
        wls.append(jnp.pad(w_l, ((0, fp - f_in), (0, fp - f_out))).astype(jnp.bfloat16))
        wrs.append(jnp.pad(w_r, ((0, fp - f_in), (0, fp - f_out))).astype(jnp.bfloat16))
        bs.append(jnp.pad(b.reshape(1, -1), ((0, 0), (0, fp - f_out))).astype(jnp.float32))
    return jnp.stack(wls), jnp.stack(wrs), jnp.stack(bs)


def sage_forward(x, adj, params, *, force_tiled=False, tm=None, tk=None):
    """GraphSAGE forward pass (eval mode). adj[i, j] != 0 <=> j -> i edge."""
    n, f_in = x.shape
    num_layers = len(params)
    out_channels = params[-1][0].shape[1]
    dims = [f_in] + [p[0].shape[1] for p in params]
    fp = _round_up(max(dims), _LANE)          # uniform lane-dense feature width
    n_pad = _round_up(n, _LANE)

    # Pre-normalize adjacency once (mean aggregation) and narrow to bf16
    # (exact-ish for 0/1 adjacency; halves the dominant HBM stream).
    deg = jnp.sum(adj, axis=1, keepdims=True)
    adj_norm = adj / jnp.maximum(deg, 1.0)
    adj_norm = jnp.pad(adj_norm, ((0, n_pad - n), (0, n_pad - n))).astype(jnp.bfloat16)
    x_p = jnp.pad(x, ((0, n_pad - n), (0, fp - f_in))).astype(jnp.bfloat16)
    wl, wr, b = _pad_params(params, fp)

    adj_bytes = n_pad * n_pad * 2
    if not force_tiled and adj_bytes <= _FUSED_ADJ_BUDGET:
        # Adjacency fits in VMEM: fuse all layers into one kernel launch.
        out = _sage_forward_fused(adj_norm, x_p, wl, wr, b)
    else:
        if tm is None or tk is None:
            tile = max(t for t in (512, 256, 128) if n_pad % t == 0)
            tm = tm or tile
            tk = tk or tile
        h = x_p
        for layer in range(num_layers):
            last = layer == num_layers - 1
            h = _sage_conv_tiled(
                adj_norm, h, wl[layer], wr[layer], b[layer],
                apply_relu=not last,
                out_dtype=jnp.float32 if last else jnp.bfloat16,
                tm=tm, tk=tk)
            # dropout: identity in eval mode
        out = h
    return out[:n, :out_channels]


# ---------------------------------------------------------------------------
# Plain-JAX references for the self-check.
# ---------------------------------------------------------------------------
def sage_reference_bf16(x, adj, params):
    """Mirrors the kernel's bf16 rounding of adj / activations (tight check)."""
    f32 = lambda a: a.astype(jnp.bfloat16).astype(jnp.float32)
    deg = jnp.sum(adj, axis=1, keepdims=True)
    adj_n = f32(adj / jnp.maximum(deg, 1.0))
    h = f32(x)
    for i, (w_l, w_r, b) in enumerate(params):
        agg = f32(adj_n @ h)
        out = agg @ f32(w_l) + h @ f32(w_r) + b.reshape(1, -1)
        if i < len(params) - 1:
            out = jnp.maximum(out, 0.0)
            h = f32(out)
        else:
            h = out
    return h


def sage_reference_f32(x, adj, params):
    """Full-precision reference of the original module's math (loose check)."""
    deg = jnp.sum(adj, axis=1, keepdims=True)
    adj_n = adj / jnp.maximum(deg, 1.0)
    h = x
    for i, (w_l, w_r, b) in enumerate(params):
        out = (adj_n @ h) @ w_l + h @ w_r + b.reshape(1, -1)
        if i < len(params) - 1:
            out = jnp.maximum(out, 0.0)
        h = out
    return h


if __name__ == "__main__":
    key = jax.random.PRNGKey(0)
    N = 256
    in_channels, hidden_channels, out_channels, num_layers = 32, 64, 16, 3

    key, kx, ka, kp = jax.random.split(key, 4)
    x = jax.random.normal(kx, (N, in_channels), jnp.float32)
    # sparse-ish binary adjacency (dense representation of adj_t)
    adj = (jax.random.uniform(ka, (N, N)) < 0.08).astype(jnp.float32)
    params = init_sage_params(kp, in_channels, hidden_channels, out_channels,
                              num_layers)

    # Fused path (all layers in one pallas_call, adj resident in VMEM).
    out_fused = sage_forward(x, adj, params)
    # Tiled path (per-layer row x K grid + accumulator) — forced with small
    # tiles here so the pl.when init/finalize accumulation logic is exercised.
    out_tiled = sage_forward(x, adj, params, force_tiled=True, tm=128, tk=128)
    jax.block_until_ready((out_fused, out_tiled))

    ref_bf16 = sage_reference_bf16(x, adj, params)
    ref_f32 = sage_reference_f32(x, adj, params)

    assert out_fused.shape == (N, out_channels)
    assert jnp.allclose(out_fused, ref_bf16, atol=1e-2, rtol=1e-2), \
        "fused kernel mismatch vs matched-precision reference"
    assert jnp.allclose(out_tiled, ref_bf16, atol=1e-2, rtol=1e-2), \
        "tiled kernel mismatch vs matched-precision reference"
    assert jnp.allclose(out_fused, ref_f32, atol=5e-2, rtol=5e-2), \
        "fused kernel mismatch vs f32 reference"

    print("KERNEL_OK")
</pallas_src>

<mosaic_0001>
module attributes {stable_mosaic.version = 11 : i64} {
  func.func @_sage_fused_kernel(%arg0: memref<256x256xbf16, #tpu.memory_space<vmem>>, %arg1: memref<256x128xbf16, #tpu.memory_space<vmem>>, %arg2: memref<3x128x128xbf16, #tpu.memory_space<vmem>>, %arg3: memref<3x128x128xbf16, #tpu.memory_space<vmem>>, %arg4: memref<3x1x128xf32, #tpu.memory_space<vmem>>, %arg5: memref<256x128xf32, #tpu.memory_space<vmem>>) attributes {dimension_semantics = [], scalar_prefetch = 0 : i64, scratch_operands = 0 : i64, tpu.core_type = #tpu.core_type<tc>} {
    %c0 = arith.constant 0 : index
    %c0_0 = arith.constant 0 : index
    %0 = vector.load %arg1[%c0, %c0_0] : memref<256x128xbf16, #tpu.memory_space<vmem>>, vector<256x128xbf16>
    %c0_1 = arith.constant 0 : index
    %c0_2 = arith.constant 0 : index
    %1 = vector.load %arg0[%c0_1, %c0_2] : memref<256x256xbf16, #tpu.memory_space<vmem>>, vector<256x256xbf16>
    %cst = arith.constant dense<0.000000e+00> : vector<256x128xf32>
    %2 = tpu.matmul %1, %0, %cst {dimension_numbers = #tpu.dot_dimension_numbers<[1], [0], [0], [1], [0, 0, 1, 1], [], []>} : vector<256x256xbf16>, vector<256x128xbf16>, vector<256x128xf32> -> vector<256x128xf32>
    %3 = arith.truncf %2 : vector<256x128xf32> to vector<256x128xbf16>
    %c0_3 = arith.constant 0 : index
    %c0_4 = arith.constant 0 : index
    %c0_5 = arith.constant 0 : index
    %4 = vector.load %arg2[%c0_3, %c0_4, %c0_5] : memref<3x128x128xbf16, #tpu.memory_space<vmem>>, vector<1x128x128xbf16>
    %5 = vector.shape_cast %4 : vector<1x128x128xbf16> to vector<128x128xbf16>
    %cst_6 = arith.constant dense<0.000000e+00> : vector<256x128xf32>
    %6 = tpu.matmul %3, %5, %cst_6 {dimension_numbers = #tpu.dot_dimension_numbers<[1], [0], [0], [1], [0, 0, 1, 1], [], []>} : vector<256x128xbf16>, vector<128x128xbf16>, vector<256x128xf32> -> vector<256x128xf32>
    %c0_7 = arith.constant 0 : index
    %c0_8 = arith.constant 0 : index
    %c0_9 = arith.constant 0 : index
    %7 = vector.load %arg3[%c0_7, %c0_8, %c0_9] : memref<3x128x128xbf16, #tpu.memory_space<vmem>>, vector<1x128x128xbf16>
    %8 = vector.shape_cast %7 : vector<1x128x128xbf16> to vector<128x128xbf16>
    %cst_10 = arith.constant dense<0.000000e+00> : vector<256x128xf32>
    %9 = tpu.matmul %0, %8, %cst_10 {dimension_numbers = #tpu.dot_dimension_numbers<[1], [0], [0], [1], [0, 0, 1, 1], [], []>} : vector<256x128xbf16>, vector<128x128xbf16>, vector<256x128xf32> -> vector<256x128xf32>
    %10 = arith.addf %6, %9 : vector<256x128xf32>
    %c0_11 = arith.constant 0 : index
    %c0_12 = arith.constant 0 : index
    %c0_13 = arith.constant 0 : index
    %11 = vector.load %arg4[%c0_11, %c0_12, %c0_13] : memref<3x1x128xf32, #tpu.memory_space<vmem>>, vector<1x1x128xf32>
    %12 = vector.shape_cast %11 : vector<1x1x128xf32> to vector<1x128xf32>
    %13 = vector.broadcast %12 : vector<1x128xf32> to vector<256x128xf32>
    %14 = arith.addf %10, %13 : vector<256x128xf32>
    %cst_14 = arith.constant 0.000000e+00 : f32
    %15 = vector.broadcast %cst_14 : f32 to vector<256x128xf32>
    %16 = arith.maximumf %14, %15 : vector<256x128xf32>
    %17 = arith.truncf %16 : vector<256x128xf32> to vector<256x128xbf16>
    %c0_15 = arith.constant 0 : index
    %c0_16 = arith.constant 0 : index
    %18 = vector.load %arg0[%c0_15, %c0_16] : memref<256x256xbf16, #tpu.memory_space<vmem>>, vector<256x256xbf16>
    %cst_17 = arith.constant dense<0.000000e+00> : vector<256x128xf32>
    %19 = tpu.matmul %18, %17, %cst_17 {dimension_numbers = #tpu.dot_dimension_numbers<[1], [0], [0], [1], [0, 0, 1, 1], [], []>} : vector<256x256xbf16>, vector<256x128xbf16>, vector<256x128xf32> -> vector<256x128xf32>
    %20 = arith.truncf %19 : vector<256x128xf32> to vector<256x128xbf16>
    %c1 = arith.constant 1 : index
    %c0_18 = arith.constant 0 : index
    %c0_19 = arith.constant 0 : index
    %21 = vector.load %arg2[%c1, %c0_18, %c0_19] : memref<3x128x128xbf16, #tpu.memory_space<vmem>>, vector<1x128x128xbf16>
    %22 = vector.shape_cast %21 : vector<1x128x128xbf16> to vector<128x128xbf16>
    %cst_20 = arith.constant dense<0.000000e+00> : vector<256x128xf32>
    %23 = tpu.matmul %20, %22, %cst_20 {dimension_numbers = #tpu.dot_dimension_numbers<[1], [0], [0], [1], [0, 0, 1, 1], [], []>} : vector<256x128xbf16>, vector<128x128xbf16>, vector<256x128xf32> -> vector<256x128xf32>
    %c1_21 = arith.constant 1 : index
    %c0_22 = arith.constant 0 : index
    %c0_23 = arith.constant 0 : index
    %24 = vector.load %arg3[%c1_21, %c0_22, %c0_23] : memref<3x128x128xbf16, #tpu.memory_space<vmem>>, vector<1x128x128xbf16>
    %25 = vector.shape_cast %24 : vector<1x128x128xbf16> to vector<128x128xbf16>
    %cst_24 = arith.constant dense<0.000000e+00> : vector<256x128xf32>
    %26 = tpu.matmul %17, %25, %cst_24 {dimension_numbers = #tpu.dot_dimension_numbers<[1], [0], [0], [1], [0, 0, 1, 1], [], []>} : vector<256x128xbf16>, vector<128x128xbf16>, vector<256x128xf32> -> vector<256x128xf32>
    %27 = arith.addf %23, %26 : vector<256x128xf32>
    %c1_25 = arith.constant 1 : index
    %c0_26 = arith.constant 0 : index
    %c0_27 = arith.constant 0 : index
    %28 = vector.load %arg4[%c1_25, %c0_26, %c0_27] : memref<3x1x128xf32, #tpu.memory_space<vmem>>, vector<1x1x128xf32>
    %29 = vector.shape_cast %28 : vector<1x1x128xf32> to vector<1x128xf32>
    %30 = vector.broadcast %29 : vector<1x128xf32> to vector<256x128xf32>
    %31 = arith.addf %27, %30 : vector<256x128xf32>
    %cst_28 = arith.constant 0.000000e+00 : f32
    %32 = vector.broadcast %cst_28 : f32 to vector<256x128xf32>
    %33 = arith.maximumf %31, %32 : vector<256x128xf32>
    %34 = arith.truncf %33 : vector<256x128xf32> to vector<256x128xbf16>
    %c0_29 = arith.constant 0 : index
    %c0_30 = arith.constant 0 : index
    %35 = vector.load %arg0[%c0_29, %c0_30] : memref<256x256xbf16, #tpu.memory_space<vmem>>, vector<256x256xbf16>
    %cst_31 = arith.constant dense<0.000000e+00> : vector<256x128xf32>
    %36 = tpu.matmul %35, %34, %cst_31 {dimension_numbers = #tpu.dot_dimension_numbers<[1], [0], [0], [1], [0, 0, 1, 1], [], []>} : vector<256x256xbf16>, vector<256x128xbf16>, vector<256x128xf32> -> vector<256x128xf32>
    %37 = arith.truncf %36 : vector<256x128xf32> to vector<256x128xbf16>
    %c2 = arith.constant 2 : index
    %c0_32 = arith.constant 0 : index
    %c0_33 = arith.constant 0 : index
    %38 = vector.load %arg2[%c2, %c0_32, %c0_33] : memref<3x128x128xbf16, #tpu.memory_space<vmem>>, vector<1x128x128xbf16>
    %39 = vector.shape_cast %38 : vector<1x128x128xbf16> to vector<128x128xbf16>
    %cst_34 = arith.constant dense<0.000000e+00> : vector<256x128xf32>
    %40 = tpu.matmul %37, %39, %cst_34 {dimension_numbers = #tpu.dot_dimension_numbers<[1], [0], [0], [1], [0, 0, 1, 1], [], []>} : vector<256x128xbf16>, vector<128x128xbf16>, vector<256x128xf32> -> vector<256x128xf32>
    %c2_35 = arith.constant 2 : index
    %c0_36 = arith.constant 0 : index
    %c0_37 = arith.constant 0 : index
    %41 = vector.load %arg3[%c2_35, %c0_36, %c0_37] : memref<3x128x128xbf16, #tpu.memory_space<vmem>>, vector<1x128x128xbf16>
    %42 = vector.shape_cast %41 : vector<1x128x128xbf16> to vector<128x128xbf16>
    %cst_38 = arith.constant dense<0.000000e+00> : vector<256x128xf32>
    %43 = tpu.matmul %34, %42, %cst_38 {dimension_numbers = #tpu.dot_dimension_numbers<[1], [0], [0], [1], [0, 0, 1, 1], [], []>} : vector<256x128xbf16>, vector<128x128xbf16>, vector<256x128xf32> -> vector<256x128xf32>
    %44 = arith.addf %40, %43 : vector<256x128xf32>
    %c2_39 = arith.constant 2 : index
    %c0_40 = arith.constant 0 : index
    %c0_41 = arith.constant 0 : index
    %45 = vector.load %arg4[%c2_39, %c0_40, %c0_41] : memref<3x1x128xf32, #tpu.memory_space<vmem>>, vector<1x1x128xf32>
    %46 = vector.shape_cast %45 : vector<1x1x128xf32> to vector<1x128xf32>
    %47 = vector.broadcast %46 : vector<1x128xf32> to vector<256x128xf32>
    %48 = arith.addf %44, %47 : vector<256x128xf32>
    %c0_42 = arith.constant 0 : index
    %c0_43 = arith.constant 0 : index
    %49 = vector.load %arg5[%c0_42, %c0_43] : memref<256x128xf32, #tpu.memory_space<vmem>>, vector<256x128xf32>
    tpu.vector_store %arg5[%c0_42, %c0_43], %48 {strides = array<i32>} : memref<256x128xf32, #tpu.memory_space<vmem>>, vector<256x128xf32>,
    return
  }
}

</mosaic_0001>

<bundles_post_ra>
// kernel: tpu_custom_call.1
= control target key start
LH: loop header
LB: loop body
LE: loop exit
PB: predicated region body
PF: predicated region fallthrough
CT: control target
= control target key end

     0   :  { %10 = vsyncpa [#allocation3], 0  ;;  %s4268_s0 = inlined_call_operand.hbm [shape: bf16[256,256], index: 0, kind: input, shape index: {}]   ;;  %s4269_s1 = inlined_call_operand.hbm [shape: bf16[256,128], index: 1, kind: input, shape index: {}]   ;;  %s4270_s2 = inlined_call_operand.hbm [shape: bf16[3,128,128], index: 2, kind: input, shape index: {}]   ;;  %s4271_s3 = inlined_call_operand.hbm [shape: bf16[3,128,128], index: 3, kind: input, shape index: {}]   ;;  %s4272_s4 = inlined_call_operand.vmem [shape: f32[3,1,128], index: 4, kind: input, shape index: {}]   ;;  %s4273_s5 = inlined_call_operand.hbm [shape: f32[256,128], index: 5, kind: output, shape index: {}]  }
   0x1   :  { %11 = vsyncpa [#allocation6], 0 }
   0x2   :  { %12 = vsyncpa [#allocation9], 0 }
   0x3   :  { %13 = vsyncpa [#allocation4], 0  ;;  %s3784_s18 = smov [#allocation5]   ;;  %s3666_s22 = scalar_lea.hbm %s4269_s1, 2048 }
   0x4   :  { %s31_s19 = sshll.u32 %s3784_s18, 4  ;;  %p3667_p0 = scmp.ne.s32.totalorder %s4269_s1, %s3666_s22  ;;  %s32_s19 = int_to_ptr.vmem [resolvable:$true] %s31_s19 }
   0x5   :  { %p3670_p1 = scmp.lt.u32.totalorder %s3666_s22, %s4269_s1 }
   0x7   :  { %p3672_p2 = pnand %p3670_p1, %p3667_p0 }
   0x9   :  { %3675 = shalt.err (!%p3672_p2)
}
   0xa   :  { %s3676_s27 = scalar_lea.vmem %s32_s19, 2048  ;;  %p3681_p4 = scmp.lt.s32.totalorder %s32_s19, %s32_s19 }
   0xb   :  { %p3677_p3 = scmp.ne.s32.totalorder %s32_s19, %s3676_s27  ;;  %p3682_p5 = scmp.lt.s32.totalorder %s3676_s27, %s3676_s27 }
   0xd   :  { %p3683_p6 = por %p3682_p5, %p3681_p4 }
   0xf   :  { %p3684_p7 = pnand %p3683_p6, %p3677_p3 }
  0x11   :  { %3687 = shalt.err (!%p3684_p7)
}
  0x12   :  { %s3785_s28 = smov 64   ;;  %s3786_s29 = smov 4  }
  0x13   :  { %37 = dma.hbm_to_vmem [thread:$0]  %s4269_s1, 2048, %s32_s19, [#allocation6], %s3785_s28, %s3785_s28, %s3786_s29  }
  0x14   :  { %s3787_s7 = smov [#allocation2]   ;;  %s3688_s11 = scalar_lea.hbm %s4268_s0, 4096 }
  0x15   :  { %s19_s8 = sshll.u32 %s3787_s7, 4  ;;  %p3689_p8 = scmp.ne.s32.totalorder %s4268_s0, %s3688_s11  ;;  %s20_s8 = int_to_ptr.vmem [resolvable:$true] %s19_s8 }
  0x16   :  { %p3692_p9 = scmp.lt.u32.totalorder %s3688_s11, %s4268_s0 }
  0x18   :  { %p3694_p10 = pnand %p3692_p9, %p3689_p8 }
  0x1a   :  { %3697 = shalt.err (!%p3694_p10)
}
  0x1b   :  { %s3698_s16 = scalar_lea.vmem %s20_s8, 4096  ;;  %p3703_p12 = scmp.lt.s32.totalorder %s20_s8, %s20_s8 }
  0x1c   :  { %p3699_p11 = scmp.ne.s32.totalorder %s20_s8, %s3698_s16  ;;  %p3704_p13 = scmp.lt.s32.totalorder %s3698_s16, %s3698_s16 }
  0x1e   :  { %p3705_p0 = por %p3704_p13, %p3703_p12 }
  0x20   :  { %p3706_p1 = pnand %p3705_p0, %p3699_p11 }
  0x22   :  { %3709 = shalt.err (!%p3706_p1)
}
  0x23   :  { %s3788_s1 = smov 128   ;;  %s3789_s17 = smov 8  }
  0x24   :  { %25 = dma.hbm_to_vmem [thread:$0]  %s4268_s0, 4096, %s20_s8, [#allocation3], %s3788_s1, %s3788_s1, %s3789_s17  }
  0x25   :  { %s3790_s20 = smov [#allocation7]   ;;  %s3791_s22 = smov [#allocation8]  }
  0x26   :  { %s43_s21 = sshll.u32 %s3790_s20, 4  ;;  %s55_s23 = sshll.u32 %s3791_s22, 4  ;;  %s44_s21 = int_to_ptr.vmem [resolvable:$true] %s43_s21  ;;  %s3853_s23 = int_to_ptr.vmem [resolvable:$true] %s55_s23 }
  0x27   :  { %s3710_s26 = scalar_lea.hbm %s4270_s2, 3072 }
  0x28   :  { %p3711_p2 = scmp.ne.s32.totalorder %s4270_s2, %s3710_s26  ;;  %p3714_p3 = scmp.lt.u32.totalorder %s3710_s26, %s4270_s2 }
  0x2a   :  { %p3716_p4 = pnand %p3714_p3, %p3711_p2 }
  0x2c   :  { %3719 = shalt.err (!%p3716_p4)
}
  0x2d   :  { %s3720_s0 = scalar_lea.vmem %s44_s21, 3072  ;;  %p3725_p6 = scmp.lt.s32.totalorder %s44_s21, %s44_s21 }
  0x2e   :  { %p3721_p5 = scmp.ne.s32.totalorder %s44_s21, %s3720_s0  ;;  %p3726_p7 = scmp.lt.s32.totalorder %s3720_s0, %s3720_s0 }
  0x30   :  { %p3727_p8 = por %p3726_p7, %p3725_p6 }
  0x32   :  { %p3728_p9 = pnand %p3727_p8, %p3721_p5 }
  0x34   :  { %3731 = shalt.err (!%p3728_p9)
}
  0x35   :  { %49 = dma.hbm_to_vmem [thread:$0]  %s4270_s2, 3072, %s44_s21, [#allocation6], %s3785_s28, %s3785_s28, %s3786_s29  }
  0x36   :  { %s3732_s12 = scalar_lea.hbm %s4271_s3, 3072 }
  0x37   :  { %p3733_p10 = scmp.ne.s32.totalorder %s4271_s3, %s3732_s12  ;;  %p3736_p11 = scmp.lt.u32.totalorder %s3732_s12, %s4271_s3 }
  0x39   :  { %p3738_p12 = pnand %p3736_p11, %p3733_p10 }
  0x3b   :  { %3741 = shalt.err (!%p3738_p12)
}
  0x3c   :  { %s3742_s18 = scalar_lea.vmem %s3853_s23, 3072  ;;  %p3747_p0 = scmp.lt.s32.totalorder %s3853_s23, %s3853_s23 }
  0x3d   :  { %p3743_p13 = scmp.ne.s32.totalorder %s3853_s23, %s3742_s18  ;;  %p3748_p1 = scmp.lt.s32.totalorder %s3742_s18, %s3742_s18 }
  0x3f   :  { %p3749_p2 = por %p3748_p1, %p3747_p0 }
  0x41   :  { %p3750_p3 = pnand %p3749_p2, %p3743_p13 }
  0x43   :  { %3753 = shalt.err (!%p3750_p3)
}
  0x44   :  { %61 = dma.hbm_to_vmem [thread:$0]  %s4271_s3, 3072, %s3853_s23, [#allocation9], %s3785_s28, %s3785_s28, %s3786_s29  }
  0x45   :  { %3776 = dma.done.wait [#allocation3], 4096  }
  0x46   :  { %3777 = vsyncadd [#allocation3], 4294963200 }
  0x47   :  { %3778 = dma.done.wait [#allocation6], 5120  }
  0x48   :  { %3779 = vsyncadd [#allocation6], 4294962176 }
  0x49   :  { %3780 = dma.done.wait [#allocation9], 3072  }
  0x4a   :  { %3781 = vsyncadd [#allocation9], 4294964224  ;;  %v3890_v0 = vld [vmem:[#allocation5 + $0x40] sm:$0xff]   ;;  %v3893_v2 = vld [vmem:[#allocation5 + $0x48] sm:$0xff]  }
  0x4b   :  { %v3523_v1 = vld [vmem:[#allocation5] sm:$0xff]   ;;  %2649 = vmatprep.subr.bf16.mxu0 %v3890_v0  ;;  %v3895_v3 = vld [vmem:[#allocation5 + $0x8] sm:$0xff]   ;;  %v3898_v4 = vld [vmem:[#allocation5 + $0x50] sm:$0xff]  }
  0x4c   :  { %2650 = vmatpush3.bf16.msra.mxu0 %v3523_v1  ;;  %3145 = vmatprep.mubr.bf16.mxu1 %v3523_v1  ;;  %v3901_v5 = vld [vmem:[#allocation5 + $0x10] sm:$0xff]   ;;  %v3904_v6 = vld [vmem:[#allocation5 + $0x58] sm:$0xff]   ;;  %v3910_v8 = vld [vmem:[#allocation5 + $0x60] sm:$0xff]  }
  0x4d   :  { %2651 = vmatprep.subr.bf16.mxu0 %v3893_v2  ;;  %v3907_v7 = vld [vmem:[#allocation5 + $0x18] sm:$0xff]   ;;  %v3912_v9 = vld [vmem:[#allocation5 + $0x20] sm:$0xff]   ;;  %v3915_v10 = vld [vmem:[#allocation5 + $0x68] sm:$0xff]  }
  0x4e   :  { %v3918_v11 = vld [vmem:[#allocation2 + $0x4] ss:$8 sps:$4 sm:$0xff]   ;;  %v3925_v13 = vld [vmem:[#allocation5 + $0x70] sm:$0xff]   ;;  %v3931_v15 = vld [vmem:[#allocation5 + $0x78] sm:$0xff]  }
  0x4f   :  { %429 = vmatprep.mubr.bf16.mxu0 %v3918_v11  ;;  %v3922_v12 = vld [vmem:[#allocation5 + $0x28] sm:$0xff]   ;;  %v3928_v14 = vld [vmem:[#allocation5 + $0x30] sm:$0xff]   ;;  %v3934_v16 = vld [vmem:[#allocation5 + $0x38] sm:$0xff]  }
  0x50   :  { %2652 = vmatpush3.bf16.msra.mxu0 %v3895_v3  ;;  %v3540_v17 = vld [vmem:[#allocation2] ss:$8 sps:$4 sm:$0xff]   ;;  %v3541_v18 = vld [vmem:[#allocation2 + $0x14] ss:$8 sps:$4 sm:$0xff]   ;;  %v3543_v19 = vld [vmem:[#allocation2 + $0x10] ss:$8 sps:$4 sm:$0xff]  }
  0x51   :  { %2653 = vmatprep.subr.bf16.mxu0 %v3898_v4  ;;  %v3544_v20 = vld [vmem:[#allocation2 + $0x24] ss:$8 sps:$4 sm:$0xff]   ;;  %v3588_v23 = vld [vmem:[#allocation8 + $0x10] sm:$0xff]   ;;  %v3938_v24 = vld [vmem:[#allocation2 + $0x20] ss:$8 sps:$4 sm:$0xff]  }
  0x52   :  { %v3586_v21 = vld [vmem:[#allocation8] sm:$0xff]   ;;  %v3587_v22 = vld [vmem:[#allocation8 + $0x8] sm:$0xff]   ;;  %v3589_v25 = vld [vmem:[#allocation8 + $0x18] sm:$0xff]  }
  0x53   :  { %3129 = vmatprep.subr.bf16.mxu1 %v3586_v21  ;;  %v3940_v26 = vld [vmem:[#allocation2 + $0x34] ss:$8 sps:$4 sm:$0xff]   ;;  %v3590_v27 = vld [vmem:[#allocation8 + $0x20] sm:$0xff]   ;;  %v3944_v28 = vld [vmem:[#allocation2 + $0x30] ss:$8 sps:$4 sm:$0xff]  }
  0x54   :  { %2654 = vmatpush3.bf16.msra.mxu0 %v3901_v5  ;;  %3130 = vmatpush3.bf16.msra.mxu1 %v3586_v21  ;;  %v3591_v29 = vld [vmem:[#allocation8 + $0x28] sm:$0xff]   ;;  %v3592_v31 = vld [vmem:[#allocation8 + $0x30] sm:$0xff]   ;;  %v3593_v33 = vld [vmem:[#allocation8 + $0x38] sm:$0xff]  }
  0x55   :  { %2655 = vmatprep.subr.bf16.mxu0 %v3904_v6  ;;  %3131 = vmatprep.subr.bf16.mxu1 %v3587_v22  ;;  %v3946_v30 = vld [vmem:[#allocation2 + $0x44] ss:$8 sps:$4 sm:$0xff]   ;;  %v3950_v32 = vld [vmem:[#allocation2 + $0x40] ss:$8 sps:$4 sm:$0xff]   ;;  %v3952_v34 = vld [vmem:[#allocation2 + $0x54] ss:$8 sps:$4 sm:$0xff]  }
  0x56   :  { %v3594_v35 = vld [vmem:[#allocation7] sm:$0xff]   ;;  %v3956_v36 = vld [vmem:[#allocation2 + $0x50] ss:$8 sps:$4 sm:$0xff]   ;;  %v3595_v37 = vld [vmem:[#allocation7 + $0x8] sm:$0xff]  }
  0x57   :  { %v3958_v38 = vld [vmem:[#allocation2 + $0x64] ss:$8 sps:$4 sm:$0xff]   ;;  %v3596_v39 = vld [vmem:[#allocation7 + $0x10] sm:$0xff]   ;;  %v3964_v40 = vld [vmem:[#allocation2 + $0x60] ss:$8 sps:$4 sm:$0xff]  }
  0x58   :  { %2656 = vmatpush3.bf16.msra.mxu0 %v3907_v7  ;;  %3132 = vmatpush3.bf16.msra.mxu1 %v3587_v22  ;;  %v3597_v41 = vld [vmem:[#allocation7 + $0x18] sm:$0xff]   ;;  %v3974_v44 = vld [vmem:[#allocation2 + $0x84] ss:$8 sps:$4 sm:$0xff]   ;;  %v3980_v45 = vld [vmem:[#allocation2 + $0x80] ss:$8 sps:$4 sm:$0xff]  }
  0x59   :  { %2657 = vmatprep.subr.bf16.mxu0 %v3910_v8  ;;  %3133 = vmatprep.subr.bf16.mxu1 %v3588_v23  ;;  %v3966_v42 = vld [vmem:[#allocation2 + $0x74] ss:$8 sps:$4 sm:$0xff]   ;;  %v3972_v43 = vld [vmem:[#allocation2 + $0x70] ss:$8 sps:$4 sm:$0xff]   ;;  %v3990_v48 = vld [vmem:[#allocation2 + $0xa4] ss:$8 sps:$4 sm:$0xff]  }
  0x5a   :  { %v3982_v46 = vld [vmem:[#allocation2 + $0x94] ss:$8 sps:$4 sm:$0xff]   ;;  %v3988_v47 = vld [vmem:[#allocation2 + $0x90] ss:$8 sps:$4 sm:$0xff]   ;;  %v3996_v49 = vld [vmem:[#allocation2 + $0xa0] ss:$8 sps:$4 sm:$0xff]  }
  0x5b   :  { %v3998_v50 = vld [vmem:[#allocation2 + $0xb4] ss:$8 sps:$4 sm:$0xff]   ;;  %v3598_v51 = vld [vmem:[#allocation7 + $0x20] sm:$0xff]   ;;  %v4004_v52 = vld [vmem:[#allocation2 + $0xb0] ss:$8 sps:$4 sm:$0xff]  }
  0x5c   :  { %2658 = vmatpush3.bf16.msra.mxu0 %v3912_v9  ;;  %3134 = vmatpush3.bf16.msra.mxu1 %v3588_v23  ;;  %v4006_v53 = vld [vmem:[#allocation2 + $0xc4] ss:$8 sps:$4 sm:$0xff]   ;;  %v3600_v55 = vld [vmem:[#allocation7 + $0x30] sm:$0xff]   ;;  %v4012_v56 = vld [vmem:[#allocation2 + $0xc0] ss:$8 sps:$4 sm:$0xff]  }
  0x5d   :  { %2659 = vmatprep.subr.bf16.mxu0 %v3915_v10  ;;  %3135 = vmatprep.subr.bf16.mxu1 %v3589_v25  ;;  %v3599_v54 = vld [vmem:[#allocation7 + $0x28] sm:$0xff]   ;;  %v4014_v57 = vld [vmem:[#allocation2 + $0xd4] ss:$8 sps:$4 sm:$0xff]   ;;  %v4019_v59 = vld [vmem:[#allocation2 + $0xd0] ss:$8 sps:$4 sm:$0xff]  }
  0x5e   :  { %v3601_v58 = vld [vmem:[#allocation7 + $0x38] sm:$0xff]   ;;  %v4021_v60 = vld [vmem:[#allocation2 + $0xe4] ss:$8 sps:$4 sm:$0xff]   ;;  %v4025_v61 = vld [vmem:[#allocation2 + $0xe0] ss:$8 sps:$4 sm:$0xff]  }
  0x5f   :  { %v4027_v62 = vld [vmem:[#allocation2 + $0xf4] ss:$8 sps:$4 sm:$0xff]   ;;  %v4031_v63 = vld [vmem:[#allocation2 + $0xf0] ss:$8 sps:$4 sm:$0xff]   ;;  %v3602_v1 = vld [vmem:[#allocation8 + $0x40] sm:$0xff]  }
  0x60   :  { %2660 = vmatpush3.bf16.msra.mxu0 %v3922_v12  ;;  %3136 = vmatpush3.bf16.msra.mxu1 %v3589_v25  ;;  %v3605_v25 = vld [vmem:[#allocation8 + $0x58] sm:$0xff]  }
  0x61   :  { %2661 = vmatprep.subr.bf16.mxu0 %v3925_v13  ;;  %3137 = vmatprep.subr.bf16.mxu1 %v3590_v27 }
  0x64   :  { %2662 = vmatpush3.bf16.msra.mxu0 %v3928_v14  ;;  %3138 = vmatpush3.bf16.msra.mxu1 %v3590_v27 }
  0x65   :  { %2663 = vmatprep.subr.bf16.mxu0 %v3931_v15  ;;  %3139 = vmatprep.subr.bf16.mxu1 %v3591_v29 }
  0x68   :  { %2664 = vmatpush3.bf16.msra.mxu0 %v3934_v16  ;;  %3140 = vmatpush3.bf16.msra.mxu1 %v3591_v29 }
  0x69   :  { %3141 = vmatprep.subr.bf16.mxu1 %v3592_v31 }
  0x6b   :  { %430 = vmatmul.mubr.bf16.vlgmr.msra.gmra.mrb[0].mxu0 %v3540_v17 }
  0x6c   :  { %437 = vmatprep.mubr.bf16.mxu0 %v3541_v18  ;;  %3142 = vmatpush3.bf16.msra.mxu1 %v3592_v31 }
  0x6d   :  { %3143 = vmatprep.subr.bf16.mxu1 %v3593_v33 }
  0x70   :  { %3144 = vmatpush3.bf16.msra.mxu1 %v3593_v33 }
  0x71   :  { %3177 = vmatprep.subr.bf16.mxu1 %v3594_v35 }
  0x73   :  { %438 = vmatmul.mubr.bf16.gmra.mrb[4].mxu0 %v3543_v19  ;;  %3146 = vmatmul.mubr.bf16.vlgmr.msra.gmra.mrb[0].mxu1 %v3895_v3 }
  0x74   :  { %445 = vmatprep.mubr.bf16.mxu0 %v3544_v20  ;;  %3149 = vmatprep.mubr.bf16.mxu1 %v3901_v5  ;;  %v3604_v20 = vld [vmem:[#allocation8 + $0x50] sm:$0xff]  }
  0x75   :  { %3178 = vmatpush3.bf16.msra.mxu1 %v3594_v35  ;;  %v3606_v35 = vld [vmem:[#allocation8 + $0x60] sm:$0xff]  }
  0x76   :  { %3179 = vmatprep.subr.bf16.mxu1 %v3595_v37 }
  0x79   :  { %3180 = vmatpush3.bf16.msra.mxu1 %v3595_v37 }
  0x7a   :  { %3181 = vmatprep.subr.bf16.mxu1 %v3596_v39 }
  0x7b   :  { %446 = vmatmul.mubr.bf16.gmra.mrb[8].mxu0 %v3938_v24  ;;  %3150 = vmatmul.mubr.bf16.gmra.mrb[4].mxu1 %v3907_v7 }
  0x7c   :  { %453 = vmatprep.mubr.bf16.mxu0 %v3940_v26  ;;  %3153 = vmatprep.mubr.bf16.mxu1 %v3912_v9 }
  0x7d   :  { %3182 = vmatpush3.bf16.msra.mxu1 %v3596_v39 }
  0x7e   :  { %3183 = vmatprep.subr.bf16.mxu1 %v3597_v41 }
  0x81   :  { %3184 = vmatpush3.bf16.msra.mxu1 %v3597_v41 }
  0x82   :  { %3185 = vmatprep.subr.bf16.mxu1 %v3598_v51 }
  0x83   :  { %454 = vmatmul.mubr.bf16.gmra.mrb[12].mxu0 %v3944_v28  ;;  %3154 = vmatmul.mubr.bf16.gmra.mrb[8].mxu1 %v3922_v12 }
  0x84   :  { %461 = vmatprep.mubr.bf16.mxu0 %v3946_v30  ;;  %3157 = vmatprep.mubr.bf16.mxu1 %v3928_v14 }
  0x85   :  { %3186 = vmatpush3.bf16.msra.mxu1 %v3598_v51  ;;  %v3607_v51 = vld [vmem:[#allocation8 + $0x68] sm:$0xff]  }
  0x86   :  { %3187 = vmatprep.subr.bf16.mxu1 %v3599_v54 }
  0x89   :  { %3188 = vmatpush3.bf16.msra.mxu1 %v3599_v54 }
  0x8a   :  { %3189 = vmatprep.subr.bf16.mxu1 %v3600_v55 }
  0x8b   :  { %462 = vmatmul.mubr.bf16.gmra.mrb[16].mxu0 %v3950_v32  ;;  %3158 = vmatmul.mubr.bf16.gmra.mrb[12].mxu1 %v3934_v16  ;;  %v3603_v16 = vld [vmem:[#allocation8 + $0x48] sm:$0xff]  }
  0x8c   :  { %469 = vmatprep.mubr.bf16.mxu0 %v3952_v34  ;;  %3161 = vmatprep.mubr.bf16.mxu1 %v3890_v0 }
  0x8d   :  { %3190 = vmatpush3.bf16.msra.mxu1 %v3600_v55 }
  0x8e   :  { %3191 = vmatprep.subr.bf16.mxu1 %v3601_v58 }
  0x91   :  { %3192 = vmatpush3.bf16.msra.mxu1 %v3601_v58 }
  0x92   :  { %3225 = vmatprep.subr.bf16.mxu1 %v3602_v1 }
  0x93   :  { %470 = vmatmul.mubr.bf16.gmra.mrb[20].mxu0 %v3956_v36  ;;  %3162 = vmatmul.mubr.bf16.gmra.mrb[16].mxu1 %v3893_v2 }
  0x94   :  { %477 = vmatprep.mubr.bf16.mxu0 %v3958_v38  ;;  %3165 = vmatprep.mubr.bf16.mxu1 %v3898_v4 }
  0x9b   :  { %478 = vmatmul.mubr.bf16.gmra.mrb[24].mxu0 %v3964_v40  ;;  %3166 = vmatmul.mubr.bf16.gmra.mrb[20].mxu1 %v3904_v6 }
  0x9c   :  { %485 = vmatprep.mubr.bf16.mxu0 %v3966_v42  ;;  %3169 = vmatprep.mubr.bf16.mxu1 %v3910_v8 }
  0xa3   :  { %486 = vmatmul.mubr.bf16.gmra.mrb[28].mxu0 %v3972_v43  ;;  %3170 = vmatmul.mubr.bf16.gmra.mrb[24].mxu1 %v3915_v10 }
  0xa4   :  { %493 = vmatprep.mubr.bf16.mxu0 %v3974_v44  ;;  %3173 = vmatprep.mubr.bf16.mxu1 %v3925_v13 }
  0xab   :  { %494 = vmatmul.mubr.bf16.gmra.mrb[32].mxu0 %v3980_v45  ;;  %3174 = vmatmul.mubr.bf16.gmra.mrb[28].mxu1 %v3931_v15 }
  0xac   :  { %501 = vmatprep.mubr.bf16.mxu0 %v3982_v46 }
  0xb3   :  { %502 = vmatmul.mubr.bf16.gmra.mrb[36].mxu0 %v3988_v47 }
  0xb4   :  { %509 = vmatprep.mubr.bf16.mxu0 %v3990_v48 }
  0xbb   :  { %510 = vmatmul.mubr.bf16.gmra.mrb[40].mxu0 %v3996_v49 }
  0xbc   :  { %517 = vmatprep.mubr.bf16.mxu0 %v3998_v50 }
  0xc3   :  { %518 = vmatmul.mubr.bf16.gmra.mrb[44].mxu0 %v4004_v52 }
  0xc4   :  { %525 = vmatprep.mubr.bf16.mxu0 %v4006_v53 }
  0xcb   :  { %526 = vmatmul.mubr.bf16.gmra.mrb[48].mxu0 %v4012_v56 }
  0xcc   :  { %533 = vmatprep.mubr.bf16.mxu0 %v4014_v57 }
  0xd3   :  { %534 = vmatmul.mubr.bf16.gmra.mrb[52].mxu0 %v4019_v59 }
  0xd4   :  { %541 = vmatprep.mubr.bf16.mxu0 %v4021_v60 }
  0xdb   :  { %542 = vmatmul.mubr.bf16.gmra.mrb[56].mxu0 %v4025_v61 }
  0xdc   :  { %549 = vmatprep.mubr.bf16.mxu0 %v4027_v62 }
  0xe3   :  { %550 = vmatmul.mubr.bf16.gmra.mrb[60].mxu0 %v4031_v63 }
  0xe4   :  { %1143 = vmatprep.mubr.bf16.mxu0 %v3918_v11 }
 0x13e   :  { %v2665_v0 = vpop.f32.mrb[0].mxu0 }
 0x13f   :  { %v2666_v2 = vpop.f32.mrb[1].mxu0 }
 0x140   :  { %v2667_v3 = vadd.f32 %v2666_v2, %v2665_v0  ;;  %v2668_v4 = vpop.f32.mrb[2].mxu0 }
 0x141   :  { %v2669_v5 = vpop.f32.mrb[3].mxu0 }
 0x142   :  { %v2670_v6 = vadd.f32 %v2669_v5, %v2668_v4 }
 0x144   :  { %v558_v7 = vpack.c.bf16 %v2670_v6, %v2667_v3 }
 0x146   :  { %v2671_v8 = vpop.f32.mrb[4].mxu0  ;;  %3193 = vmatprep.mubr.bf16.mxu1 %v558_v7 }
 0x147   :  { %v2672_v9 = vpop.f32.mrb[5].mxu0 }
 0x148   :  { %v2673_v10 = vadd.f32 %v2672_v9, %v2671_v8  ;;  %v2674_v12 = vpop.f32.mrb[6].mxu0 }
 0x149   :  { %v2675_v13 = vpop.f32.mrb[7].mxu0 }
 0x14a   :  { %v2676_v14 = vadd.f32 %v2675_v13, %v2674_v12 }
 0x14c   :  { %v559_v15 = vpack.c.bf16 %v2676_v14, %v2673_v10 }
 0x14e   :  { %v2677_v17 = vpop.f32.mrb[8].mxu0  ;;  %3194 = vmatmul.mubr.bf16.vlgmr.msra.gmra.mrb[0].mxu1 %v559_v15 }
 0x14f   :  { %v2678_v11 = vpop.f32.mrb[9].mxu0  ;;  %3226 = vmatpush3.bf16.msra.mxu1 %v3602_v1 }
 0x150   :  { %v2679_v18 = vadd.f32 %v2678_v11, %v2677_v17  ;;  %v2680_v19 = vpop.f32.mrb[10].mxu0  ;;  %3227 = vmatprep.subr.bf16.mxu1 %v3603_v16 }
 0x151   :  { %v2681_v21 = vpop.f32.mrb[11].mxu0 }
 0x152   :  { %v2682_v22 = vadd.f32 %v2681_v21, %v2680_v19 }
 0x153   :  { %3228 = vmatpush3.bf16.msra.mxu1 %v3603_v16 }
 0x154   :  { %v560_v23 = vpack.c.bf16 %v2682_v22, %v2679_v18  ;;  %3229 = vmatprep.subr.bf16.mxu1 %v3604_v20 }
 0x156   :  { %v2683_v27 = vpop.f32.mrb[12].mxu0  ;;  %3197 = vmatprep.mubr.bf16.mxu1 %v560_v23 }
 0x157   :  { %v2684_v29 = vpop.f32.mrb[13].mxu0  ;;  %3230 = vmatpush3.bf16.msra.mxu1 %v3604_v20 }
 0x158   :  { %v2685_v31 = vadd.f32 %v2684_v29, %v2683_v27  ;;  %v2686_v33 = vpop.f32.mrb[14].mxu0  ;;  %3231 = vmatprep.subr.bf16.mxu1 %v3605_v25 }
 0x159   :  { %v2687_v37 = vpop.f32.mrb[15].mxu0 }
 0x15a   :  { %v2688_v39 = vadd.f32 %v2687_v37, %v2686_v33 }
 0x15b   :  { %3232 = vmatpush3.bf16.msra.mxu1 %v3605_v25 }
 0x15c   :  { %v561_v41 = vpack.c.bf16 %v2688_v39, %v2685_v31  ;;  %3233 = vmatprep.subr.bf16.mxu1 %v3606_v35 }
 0x15e   :  { %v2689_v54 = vpop.f32.mrb[16].mxu0  ;;  %3198 = vmatmul.mubr.bf16.gmra.mrb[4].mxu1 %v561_v41 }
 0x15f   :  { %v2690_v55 = vpop.f32.mrb[17].mxu0  ;;  %3234 = vmatpush3.bf16.msra.mxu1 %v3606_v35 }
 0x160   :  { %v2691_v58 = vadd.f32 %v2690_v55, %v2689_v54  ;;  %v2692_v0 = vpop.f32.mrb[18].mxu0  ;;  %3235 = vmatprep.subr.bf16.mxu1 %v3607_v51 }
 0x161   :  { %v2693_v1 = vpop.f32.mrb[19].mxu0 }
 0x162   :  { %v2694_v2 = vadd.f32 %v2693_v1, %v2692_v0 }
 0x163   :  { %3236 = vmatpush3.bf16.msra.mxu1 %v3607_v51 }
 0x164   :  { %v562_v3 = vpack.c.bf16 %v2694_v2, %v2691_v58 }
 0x166   :  { %v2695_v4 = vpop.f32.mrb[20].mxu0  ;;  %3201 = vmatprep.mubr.bf16.mxu1 %v562_v3 }
 0x167   :  { %v2696_v5 = vpop.f32.mrb[21].mxu0 }
 0x168   :  { %v2697_v6 = vadd.f32 %v2696_v5, %v2695_v4  ;;  %v2698_v7 = vpop.f32.mrb[22].mxu0 }
 0x169   :  { %v2699_v8 = vpop.f32.mrb[23].mxu0 }
 0x16a   :  { %v2700_v9 = vadd.f32 %v2699_v8, %v2698_v7 }
 0x16c   :  { %v563_v10 = vpack.c.bf16 %v2700_v9, %v2697_v6 }
 0x16e   :  { %v2701_v12 = vpop.f32.mrb[24].mxu0  ;;  %3202 = vmatmul.mubr.bf16.gmra.mrb[8].mxu1 %v563_v10 }
 0x16f   :  { %v2702_v13 = vpop.f32.mrb[25].mxu0 }
 0x170   :  { %v2703_v14 = vadd.f32 %v2702_v13, %v2701_v12  ;;  %v2704_v15 = vpop.f32.mrb[26].mxu0 }
 0x171   :  { %v2705_v16 = vpop.f32.mrb[27].mxu0 }
 0x172   :  { %v2706_v17 = vadd.f32 %v2705_v16, %v2704_v15 }
 0x174   :  { %v564_v11 = vpack.c.bf16 %v2706_v17, %v2703_v14 }
 0x176   :  { %v2707_v18 = vpop.f32.mrb[28].mxu0  ;;  %3205 = vmatprep.mubr.bf16.mxu1 %v564_v11 }
 0x177   :  { %v2708_v19 = vpop.f32.mrb[29].mxu0 }
 0x178   :  { %v2709_v20 = vadd.f32 %v2708_v19, %v2707_v18  ;;  %v2710_v21 = vpop.f32.mrb[30].mxu0 }
 0x179   :  { %v2711_v22 = vpop.f32.mrb[31].mxu0 }
 0x17a   :  { %v2712_v23 = vadd.f32 %v2711_v22, %v2710_v21  ;;  %v3608_v22 = vld [vmem:[#allocation8 + $0x70] sm:$0xff]  }
 0x17b   :  { %3237 = vmatprep.subr.bf16.mxu1 %v3608_v22 }
 0x17c   :  { %v565_v25 = vpack.c.bf16 %v2712_v23, %v2709_v20  ;;  %3238 = vmatpush3.bf16.msra.mxu1 %v3608_v22 }
 0x17e   :  { %v2713_v27 = vpop.f32.mrb[32].mxu0  ;;  %3206 = vmatmul.mubr.bf16.gmra.mrb[12].mxu1 %v565_v25 }
 0x17f   :  { %v2714_v29 = vpop.f32.mrb[33].mxu0 }
 0x180   :  { %v2715_v31 = vadd.f32 %v2714_v29, %v2713_v27  ;;  %v2716_v33 = vpop.f32.mrb[34].mxu0  ;;  %v3609_v27 = vld [vmem:[#allocation8 + $0x78] sm:$0xff]  }
 0x181   :  { %v2717_v35 = vpop.f32.mrb[35].mxu0  ;;  %3239 = vmatprep.subr.bf16.mxu1 %v3609_v27 }
 0x182   :  { %v2718_v37 = vadd.f32 %v2717_v35, %v2716_v33  ;;  %3240 = vmatpush3.bf16.msra.mxu1 %v3609_v27 }
 0x184   :  { %v566_v39 = vpack.c.bf16 %v2718_v37, %v2715_v31 }
 0x186   :  { %v2719_v41 = vpop.f32.mrb[36].mxu0  ;;  %3209 = vmatprep.mubr.bf16.mxu1 %v566_v39 }
 0x187   :  { %v2720_v51 = vpop.f32.mrb[37].mxu0 }
 0x188   :  { %v2721_v54 = vadd.f32 %v2720_v51, %v2719_v41  ;;  %v2722_v55 = vpop.f32.mrb[38].mxu0 }
 0x189   :  { %v2723_v58 = vpop.f32.mrb[39].mxu0 }
 0x18a   :  { %v2724_v0 = vadd.f32 %v2723_v58, %v2722_v55 }
 0x18c   :  { %v567_v1 = vpack.c.bf16 %v2724_v0, %v2721_v54 }
 0x18e   :  { %v2725_v2 = vpop.f32.mrb[40].mxu0  ;;  %3210 = vmatmul.mubr.bf16.gmra.mrb[16].mxu1 %v567_v1 }
 0x18f   :  { %v2726_v3 = vpop.f32.mrb[41].mxu0 }
 0x190   :  { %v2727_v4 = vadd.f32 %v2726_v3, %v2725_v2  ;;  %v2728_v5 = vpop.f32.mrb[42].mxu0 }
 0x191   :  { %v2729_v6 = vpop.f32.mrb[43].mxu0 }
 0x192   :  { %v2730_v7 = vadd.f32 %v2729_v6, %v2728_v5 }
 0x194   :  { %v568_v8 = vpack.c.bf16 %v2730_v7, %v2727_v4 }
 0x196   :  { %v2731_v9 = vpop.f32.mrb[44].mxu0  ;;  %3213 = vmatprep.mubr.bf16.mxu1 %v568_v8 }
 0x197   :  { %v2732_v10 = vpop.f32.mrb[45].mxu0 }
 0x198   :  { %v2733_v12 = vadd.f32 %v2732_v10, %v2731_v9  ;;  %v2734_v13 = vpop.f32.mrb[46].mxu0  ;;  %v4038_v9 = vld [vmem:[%s4272_s4] ss:$0 sm:$0xff] }
 0x199   :  { %v2735_v14 = vpop.f32.mrb[47].mxu0 }
 0x19a   :  { %v2736_v15 = vadd.f32 %v2735_v14, %v2734_v13 }
 0x19c   :  { %v569_v16 = vpack.c.bf16 %v2736_v15, %v2733_v12 }
 0x19e   :  { %v2737_v17 = vpop.f32.mrb[48].mxu0  ;;  %3214 = vmatmul.mubr.bf16.gmra.mrb[20].mxu1 %v569_v16 }
 0x19f   :  { %v2738_v11 = vpop.f32.mrb[49].mxu0 }
 0x1a0   :  { %v2739_v18 = vadd.f32 %v2738_v11, %v2737_v17  ;;  %v2740_v19 = vpop.f32.mrb[50].mxu0 }
 0x1a1   :  { %v2741_v20 = vpop.f32.mrb[51].mxu0 }
 0x1a2   :  { %v2742_v21 = vadd.f32 %v2741_v20, %v2740_v19 }
 0x1a4   :  { %v570_v23 = vpack.c.bf16 %v2742_v21, %v2739_v18 }
 0x1a6   :  { %v2743_v25 = vpop.f32.mrb[52].mxu0  ;;  %3217 = vmatprep.mubr.bf16.mxu1 %v570_v23 }
 0x1a7   :  { %v2744_v29 = vpop.f32.mrb[53].mxu0 }
 0x1a8   :  { %v2745_v31 = vadd.f32 %v2744_v29, %v2743_v25  ;;  %v2746_v33 = vpop.f32.mrb[54].mxu0 }
 0x1a9   :  { %v2747_v35 = vpop.f32.mrb[55].mxu0 }
 0x1aa   :  { %v2748_v37 = vadd.f32 %v2747_v35, %v2746_v33 }
 0x1ac   :  { %v571_v39 = vpack.c.bf16 %v2748_v37, %v2745_v31 }
 0x1ae   :  { %v2749_v41 = vpop.f32.mrb[56].mxu0  ;;  %3218 = vmatmul.mubr.bf16.gmra.mrb[24].mxu1 %v571_v39 }
 0x1af   :  { %v2750_v51 = vpop.f32.mrb[57].mxu0 }
 0x1b0   :  { %v2751_v54 = vadd.f32 %v2750_v51, %v2749_v41  ;;  %v2752_v55 = vpop.f32.mrb[58].mxu0 }
 0x1b1   :  { %v2753_v58 = vpop.f32.mrb[59].mxu0 }
 0x1b2   :  { %v2754_v0 = vadd.f32 %v2753_v58, %v2752_v55 }
 0x1b4   :  { %v572_v1 = vpack.c.bf16 %v2754_v0, %v2751_v54 }
 0x1b6   :  { %v2755_v2 = vpop.f32.mrb[60].mxu0  ;;  %3221 = vmatprep.mubr.bf16.mxu1 %v572_v1 }
 0x1b7   :  { %v2756_v3 = vpop.f32.mrb[61].mxu0 }
 0x1b8   :  { %v2757_v4 = vadd.f32 %v2756_v3, %v2755_v2  ;;  %v2758_v5 = vpop.f32.mrb[62].mxu0 }
 0x1b9   :  { %v2759_v6 = vpop.f32.mrb[63].mxu0 }
 0x1ba   :  { %v2760_v7 = vadd.f32 %v2759_v6, %v2758_v5 }
 0x1bc   :  { %v573_v8 = vpack.c.bf16 %v2760_v7, %v2757_v4 }
 0x1be   :  { %3222 = vmatmul.mubr.bf16.gmra.mrb[28].mxu1 %v573_v8 }
 0x221   :  { %v3195_v10 = vpop.f32.mrb[0].mxu1 }
 0x222   :  { %v1033_v12 = vadd.f32 %v3195_v10, %v4038_v9  ;;  %v897_v13 = vpop.f32.mrb[1].mxu1 }
 0x223   :  { %v1031_v14 = vadd.f32 %v4038_v9, %v897_v13  ;;  %v3196_v15 = vpop.f32.mrb[2].mxu1 }
 0x224   :  { %v1034_v16 = vadd.f32 %v3196_v15, %v4038_v9  ;;  %v900_v17 = vpop.f32.mrb[3].mxu1  ;;  %v1065_v18 = vmax.f32 %v1033_v12, 0.0 }
 0x225   :  { %v1032_v11 = vadd.f32 %v4038_v9, %v900_v17  ;;  %v1063_v20 = vmax.f32 %v1031_v14, 0.0 }
 0x226   :  { %v1066_v19 = vmax.f32 %v1034_v16, 0.0 }
 0x227   :  { %v1064_v21 = vmax.f32 %v1032_v11, 0.0 }
 0x228   :  { %v4044_v22 = vpack.c.bf16 %v1066_v19, %v1065_v18 }
 0x229   :  { %v4046_v23 = vpack.c.bf16 %v1064_v21, %v1063_v20 }
 0x22b   :  { %3241 = vmatprep.mubr.bf16.mxu1 %v4046_v23 }
 0x22c   :  { %3242 = vmatmul.mubr.bf16.vlgmr.msra.gmra.mrb[32].mxu1 %v4044_v22 }
 0x231   :  { %v3199_v25 = vpop.f32.mrb[4].mxu1 }
 0x232   :  { %v1037_v27 = vadd.f32 %v3199_v25, %v4038_v9  ;;  %v913_v29 = vpop.f32.mrb[5].mxu1 }
 0x233   :  { %v1035_v31 = vadd.f32 %v4038_v9, %v913_v29  ;;  %v3200_v33 = vpop.f32.mrb[6].mxu1 }
 0x234   :  { %v1038_v35 = vadd.f32 %v3200_v33, %v4038_v9  ;;  %v916_v37 = vpop.f32.mrb[7].mxu1  ;;  %v1069_v41 = vmax.f32 %v1037_v27, 0.0 }
 0x235   :  { %v1036_v39 = vadd.f32 %v4038_v9, %v916_v37  ;;  %v1067_v54 = vmax.f32 %v1035_v31, 0.0 }
 0x236   :  { %v1070_v51 = vmax.f32 %v1038_v35, 0.0 }
 0x237   :  { %v1068_v55 = vmax.f32 %v1036_v39, 0.0 }
 0x238   :  { %v4054_v58 = vpack.c.bf16 %v1070_v51, %v1069_v41 }
 0x239   :  { %v4056_v0 = vpack.c.bf16 %v1068_v55, %v1067_v54 }
 0x23b   :  { %3245 = vmatprep.mubr.bf16.mxu1 %v4056_v0 }
 0x23c   :  { %3246 = vmatmul.mubr.bf16.gmra.mrb[36].mxu1 %v4054_v58 }
 0x241   :  { %v3203_v1 = vpop.f32.mrb[8].mxu1 }
 0x242   :  { %v1041_v2 = vadd.f32 %v3203_v1, %v4038_v9  ;;  %v929_v3 = vpop.f32.mrb[9].mxu1 }
 0x243   :  { %v1039_v4 = vadd.f32 %v4038_v9, %v929_v3  ;;  %v3204_v5 = vpop.f32.mrb[10].mxu1 }
 0x244   :  { %v1042_v6 = vadd.f32 %v3204_v5, %v4038_v9  ;;  %v932_v7 = vpop.f32.mrb[11].mxu1  ;;  %v1073_v10 = vmax.f32 %v1041_v2, 0.0 }
 0x245   :  { %v1040_v8 = vadd.f32 %v4038_v9, %v932_v7  ;;  %v1071_v13 = vmax.f32 %v1039_v4, 0.0 }
 0x246   :  { %v1074_v12 = vmax.f32 %v1042_v6, 0.0 }
 0x247   :  { %v1072_v14 = vmax.f32 %v1040_v8, 0.0 }
 0x248   :  { %v4064_v15 = vpack.c.bf16 %v1074_v12, %v1073_v10 }
 0x249   :  { %v4066_v16 = vpack.c.bf16 %v1072_v14, %v1071_v13 }
 0x24b   :  { %3249 = vmatprep.mubr.bf16.mxu1 %v4066_v16 }
 0x24c   :  { %3250 = vmatmul.mubr.bf16.gmra.mrb[40].mxu1 %v4064_v15 }
 0x251   :  { %v3207_v17 = vpop.f32.mrb[12].mxu1 }
 0x252   :  { %v1045_v11 = vadd.f32 %v3207_v17, %v4038_v9  ;;  %v945_v18 = vpop.f32.mrb[13].mxu1 }
 0x253   :  { %v1043_v19 = vadd.f32 %v4038_v9, %v945_v18  ;;  %v3208_v20 = vpop.f32.mrb[14].mxu1 }
 0x254   :  { %v1046_v21 = vadd.f32 %v3208_v20, %v4038_v9  ;;  %v948_v25 = vpop.f32.mrb[15].mxu1  ;;  %v1077_v29 = vmax.f32 %v1045_v11, 0.0 }
 0x255   :  { %v1044_v27 = vadd.f32 %v4038_v9, %v948_v25  ;;  %v1075_v33 = vmax.f32 %v1043_v19, 0.0 }
 0x256   :  { %v1078_v31 = vmax.f32 %v1046_v21, 0.0 }
 0x257   :  { %v1076_v35 = vmax.f32 %v1044_v27, 0.0 }
 0x258   :  { %v4074_v37 = vpack.c.bf16 %v1078_v31, %v1077_v29 }
 0x259   :  { %v4076_v39 = vpack.c.bf16 %v1076_v35, %v1075_v33 }
 0x25b   :  { %3253 = vmatprep.mubr.bf16.mxu1 %v4076_v39 }
 0x25c   :  { %3254 = vmatmul.mubr.bf16.gmra.mrb[44].mxu1 %v4074_v37 }
 0x261   :  { %v3211_v41 = vpop.f32.mrb[16].mxu1 }
 0x262   :  { %v1049_v51 = vadd.f32 %v3211_v41, %v4038_v9  ;;  %v961_v54 = vpop.f32.mrb[17].mxu1 }
 0x263   :  { %v1047_v55 = vadd.f32 %v4038_v9, %v961_v54  ;;  %v3212_v1 = vpop.f32.mrb[18].mxu1 }
 0x264   :  { %v1050_v2 = vadd.f32 %v3212_v1, %v4038_v9  ;;  %v964_v3 = vpop.f32.mrb[19].mxu1  ;;  %v1081_v5 = vmax.f32 %v1049_v51, 0.0 }
 0x265   :  { %v1048_v4 = vadd.f32 %v4038_v9, %v964_v3  ;;  %v1079_v7 = vmax.f32 %v1047_v55, 0.0 }
 0x266   :  { %v1082_v6 = vmax.f32 %v1050_v2, 0.0 }
 0x267   :  { %v1080_v8 = vmax.f32 %v1048_v4, 0.0 }
 0x268   :  { %v1104_v10 = vpack.c.bf16 %v1082_v6, %v1081_v5 }
 0x269   :  { %v1103_v12 = vpack.c.bf16 %v1080_v8, %v1079_v7 }
 0x26b   :  { %2809 = vmatprep.subr.bf16.mxu0 %v1103_v12  ;;  %3257 = vmatprep.mubr.bf16.mxu1 %v1103_v12 }
 0x26c   :  { %2810 = vmatpush3.bf16.msra.mxu0 %v4046_v23  ;;  %3258 = vmatmul.mubr.bf16.gmra.mrb[48].mxu1 %v1104_v10 }
 0x26d   :  { %2811 = vmatprep.subr.bf16.mxu0 %v1104_v10 }
 0x270   :  { %2812 = vmatpush3.bf16.msra.mxu0 %v4044_v22 }
 0x271   :  { %v3215_v13 = vpop.f32.mrb[20].mxu1 }
 0x272   :  { %v1053_v14 = vadd.f32 %v3215_v13, %v4038_v9  ;;  %v977_v17 = vpop.f32.mrb[21].mxu1 }
 0x273   :  { %v1051_v11 = vadd.f32 %v4038_v9, %v977_v17  ;;  %v3216_v18 = vpop.f32.mrb[22].mxu1 }
 0x274   :  { %v1054_v19 = vadd.f32 %v3216_v18, %v4038_v9  ;;  %v980_v20 = vpop.f32.mrb[23].mxu1  ;;  %v1085_v25 = vmax.f32 %v1053_v14, 0.0 }
 0x275   :  { %v1052_v21 = vadd.f32 %v4038_v9, %v980_v20  ;;  %v1083_v29 = vmax.f32 %v1051_v11, 0.0 }
 0x276   :  { %v1086_v27 = vmax.f32 %v1054_v19, 0.0 }
 0x277   :  { %v1084_v23 = vmax.f32 %v1052_v21, 0.0 }
 0x278   :  { %v1106_v31 = vpack.c.bf16 %v1086_v27, %v1085_v25  ;;  %v3611_v27 = vld [vmem:[#allocation7 + $0x48] sm:$0xff]  }
 0x279   :  { %v1105_v33 = vpack.c.bf16 %v1084_v23, %v1083_v29  ;;  %v3612_v29 = vld [vmem:[#allocation7 + $0x50] sm:$0xff]   ;;  %v3613_v23 = vld [vmem:[#allocation7 + $0x58] sm:$0xff]  }
 0x27b   :  { %2813 = vmatprep.subr.bf16.mxu0 %v1105_v33  ;;  %3261 = vmatprep.mubr.bf16.mxu1 %v1105_v33  ;;  %v4113_v33 = vld [vmem:[#allocation2 + $0x24] ss:$8 sps:$4 sm:$0xff]  }
 0x27c   :  { %2814 = vmatpush3.bf16.msra.mxu0 %v4056_v0  ;;  %3262 = vmatmul.mubr.bf16.gmra.mrb[52].mxu1 %v1106_v31 }
 0x27d   :  { %2815 = vmatprep.subr.bf16.mxu0 %v1106_v31  ;;  %v4107_v31 = vld [vmem:[#allocation2 + $0x14] ss:$8 sps:$4 sm:$0xff]  }
 0x280   :  { %2816 = vmatpush3.bf16.msra.mxu0 %v4054_v58 }
 0x281   :  { %v3219_v22 = vpop.f32.mrb[24].mxu1 }
 0x282   :  { %v1057_v35 = vadd.f32 %v3219_v22, %v4038_v9  ;;  %v993_v41 = vpop.f32.mrb[25].mxu1 }
 0x283   :  { %v1055_v51 = vadd.f32 %v4038_v9, %v993_v41  ;;  %v3220_v54 = vpop.f32.mrb[26].mxu1 }
 0x284   :  { %v1058_v55 = vadd.f32 %v3220_v54, %v4038_v9  ;;  %v996_v1 = vpop.f32.mrb[27].mxu1  ;;  %v1089_v3 = vmax.f32 %v1057_v35, 0.0  ;;  %v3621_v35 = vld [vmem:[#allocation8 + $0x98] sm:$0xff]  }
 0x285   :  { %v1056_v2 = vadd.f32 %v4038_v9, %v996_v1  ;;  %v1087_v5 = vmax.f32 %v1055_v51, 0.0  ;;  %v3622_v1 = vld [vmem:[#allocation8 + $0xa0] sm:$0xff]  }
 0x286   :  { %v1090_v4 = vmax.f32 %v1058_v55, 0.0 }
 0x287   :  { %v1088_v0 = vmax.f32 %v1056_v2, 0.0 }
 0x288   :  { %v1108_v6 = vpack.c.bf16 %v1090_v4, %v1089_v3 }
 0x289   :  { %v1107_v7 = vpack.c.bf16 %v1088_v0, %v1087_v5  ;;  %v3623_v5 = vld [vmem:[#allocation8 + $0xa8] sm:$0xff]  }
 0x28b   :  { %2817 = vmatprep.subr.bf16.mxu0 %v1107_v7  ;;  %3265 = vmatprep.mubr.bf16.mxu1 %v1107_v7 }
 0x28c   :  { %2818 = vmatpush3.bf16.msra.mxu0 %v4066_v16  ;;  %3266 = vmatmul.mubr.bf16.gmra.mrb[56].mxu1 %v1108_v6 }
 0x28d   :  { %2819 = vmatprep.subr.bf16.mxu0 %v1108_v6 }
 0x290   :  { %2820 = vmatpush3.bf16.msra.mxu0 %v4064_v15  ;;  %v3610_v15 = vld [vmem:[#allocation7 + $0x40] sm:$0xff]  }
 0x291   :  { %v3223_v58 = vpop.f32.mrb[28].mxu1  ;;  %3273 = vmatprep.subr.bf16.mxu1 %v3610_v15 }
 0x292   :  { %v1061_v8 = vadd.f32 %v3223_v58, %v4038_v9  ;;  %v1009_v10 = vpop.f32.mrb[29].mxu1  ;;  %3274 = vmatpush3.bf16.msra.mxu1 %v3610_v15 }
 0x293   :  { %v1059_v12 = vadd.f32 %v4038_v9, %v1009_v10  ;;  %v3224_v13 = vpop.f32.mrb[30].mxu1  ;;  %3275 = vmatprep.subr.bf16.mxu1 %v3611_v27 }
 0x294   :  { %v1062_v14 = vadd.f32 %v3224_v13, %v4038_v9  ;;  %v1012_v17 = vpop.f32.mrb[31].mxu1  ;;  %v1093_v18 = vmax.f32 %v1061_v8, 0.0 }
 0x295   :  { %v1060_v11 = vadd.f32 %v4038_v9, %v1012_v17  ;;  %v1091_v20 = vmax.f32 %v1059_v12, 0.0  ;;  %v4104_v9 = vld [vmem:[#allocation2] ss:$8 sps:$4 sm:$0xff]  }
 0x296   :  { %v1094_v19 = vmax.f32 %v1062_v14, 0.0  ;;  %3276 = vmatpush3.bf16.msra.mxu1 %v3611_v27 }
 0x297   :  { %v1092_v16 = vmax.f32 %v1060_v11, 0.0  ;;  %3277 = vmatprep.subr.bf16.mxu1 %v3612_v29 }
 0x298   :  { %v1110_v21 = vpack.c.bf16 %v1094_v19, %v1093_v18 }
 0x299   :  { %v1109_v25 = vpack.c.bf16 %v1092_v16, %v1091_v20 }
 0x29a   :  { %3278 = vmatpush3.bf16.msra.mxu1 %v3612_v29 }
 0x29b   :  { %2821 = vmatprep.subr.bf16.mxu0 %v1109_v25  ;;  %3269 = vmatprep.mubr.bf16.mxu1 %v1109_v25 }
 0x29c   :  { %2822 = vmatpush3.bf16.msra.mxu0 %v4076_v39  ;;  %3270 = vmatmul.mubr.bf16.gmra.mrb[60].mxu1 %v1110_v21  ;;  %v4110_v39 = vld [vmem:[#allocation2 + $0x10] ss:$8 sps:$4 sm:$0xff]  }
 0x29d   :  { %2823 = vmatprep.subr.bf16.mxu0 %v1110_v21  ;;  %3279 = vmatprep.subr.bf16.mxu1 %v3613_v23 }
 0x29e   :  { %3280 = vmatpush3.bf16.msra.mxu1 %v3613_v23 }
 0x2a0   :  { %2824 = vmatpush3.bf16.msra.mxu0 %v4074_v37 }
 0x2a3   :  { %1144 = vmatmul.mubr.bf16.vlgmr.msra.gmra.mrb[64].mxu0 %v4104_v9 }
 0x2a4   :  { %1151 = vmatprep.mubr.bf16.mxu0 %v4107_v31 }
 0x2ab   :  { %1152 = vmatmul.mubr.bf16.gmra.mrb[68].mxu0 %v4110_v39 }
 0x2ac   :  { %1159 = vmatprep.mubr.bf16.mxu0 %v4113_v33 }
 0x2b3   :  { %1160 = vmatmul.mubr.bf16.gmra.mrb[72].mxu0 %v3938_v24  ;;  %v3614_v24 = vld [vmem:[#allocation7 + $0x60] sm:$0xff]  }
 0x2b4   :  { %1167 = vmatprep.mubr.bf16.mxu0 %v3940_v26  ;;  %3281 = vmatprep.subr.bf16.mxu1 %v3614_v24  ;;  %v3615_v26 = vld [vmem:[#allocation7 + $0x68] sm:$0xff]  }
 0x2b5   :  { %3282 = vmatpush3.bf16.msra.mxu1 %v3614_v24 }
 0x2b6   :  { %3283 = vmatprep.subr.bf16.mxu1 %v3615_v26 }
 0x2b9   :  { %3284 = vmatpush3.bf16.msra.mxu1 %v3615_v26 }
 0x2bb   :  { %1168 = vmatmul.mubr.bf16.gmra.mrb[76].mxu0 %v3944_v28  ;;  %v3616_v28 = vld [vmem:[#allocation7 + $0x70] sm:$0xff]  }
 0x2bc   :  { %1175 = vmatprep.mubr.bf16.mxu0 %v3946_v30  ;;  %3285 = vmatprep.subr.bf16.mxu1 %v3616_v28  ;;  %v3617_v30 = vld [vmem:[#allocation7 + $0x78] sm:$0xff]  }
 0x2bd   :  { %3286 = vmatpush3.bf16.msra.mxu1 %v3616_v28 }
 0x2be   :  { %3287 = vmatprep.subr.bf16.mxu1 %v3617_v30 }
 0x2c1   :  { %3288 = vmatpush3.bf16.msra.mxu1 %v3617_v30 }
 0x2c3   :  { %1176 = vmatmul.mubr.bf16.gmra.mrb[80].mxu0 %v3950_v32  ;;  %v3638_v32 = vld [vmem:[#allocation2 + $0x4] ss:$8 sps:$4 sm:$0xff]  }
 0x2c4   :  { %1183 = vmatprep.mubr.bf16.mxu0 %v3952_v34 }
 0x2cb   :  { %1184 = vmatmul.mubr.bf16.gmra.mrb[84].mxu0 %v3956_v36  ;;  %v3618_v36 = vld [vmem:[#allocation8 + $0x80] sm:$0xff]  }
 0x2cc   :  { %1191 = vmatprep.mubr.bf16.mxu0 %v3958_v38  ;;  %3321 = vmatprep.subr.bf16.mxu1 %v3618_v36 }
 0x2d3   :  { %1192 = vmatmul.mubr.bf16.gmra.mrb[88].mxu0 %v3964_v40 }
 0x2d4   :  { %1199 = vmatprep.mubr.bf16.mxu0 %v3966_v42 }
 0x2db   :  { %1200 = vmatmul.mubr.bf16.gmra.mrb[92].mxu0 %v3972_v43 }
 0x2dc   :  { %1207 = vmatprep.mubr.bf16.mxu0 %v3974_v44 }
 0x2e3   :  { %1208 = vmatmul.mubr.bf16.gmra.mrb[96].mxu0 %v3980_v45 }
 0x2e4   :  { %1215 = vmatprep.mubr.bf16.mxu0 %v3982_v46 }
 0x2eb   :  { %1216 = vmatmul.mubr.bf16.gmra.mrb[100].mxu0 %v3988_v47 }
 0x2ec   :  { %1223 = vmatprep.mubr.bf16.mxu0 %v3990_v48 }
 0x2f3   :  { %1224 = vmatmul.mubr.bf16.gmra.mrb[104].mxu0 %v3996_v49 }
 0x2f4   :  { %1231 = vmatprep.mubr.bf16.mxu0 %v3998_v50 }
 0x2fb   :  { %1232 = vmatmul.mubr.bf16.gmra.mrb[108].mxu0 %v4004_v52 }
 0x2fc   :  { %1239 = vmatprep.mubr.bf16.mxu0 %v4006_v53 }
 0x303   :  { %1240 = vmatmul.mubr.bf16.gmra.mrb[112].mxu0 %v4012_v56  ;;  %v3619_v56 = vld [vmem:[#allocation8 + $0x88] sm:$0xff]  }
 0x304   :  { %1247 = vmatprep.mubr.bf16.mxu0 %v4014_v57 }
 0x30b   :  { %1248 = vmatmul.mubr.bf16.gmra.mrb[116].mxu0 %v4019_v59 }
 0x30c   :  { %1255 = vmatprep.mubr.bf16.mxu0 %v4021_v60 }
 0x313   :  { %1256 = vmatmul.mubr.bf16.gmra.mrb[120].mxu0 %v4025_v61 }
 0x314   :  { %1263 = vmatprep.mubr.bf16.mxu0 %v4027_v62  ;;  %v3620_v62 = vld [vmem:[#allocation8 + $0x90] sm:$0xff]  }
 0x31b   :  { %1264 = vmatmul.mubr.bf16.gmra.mrb[124].mxu0 %v4031_v63 }
 0x31c   :  { %1860 = vmatprep.mubr.bf16.mxu0 %v3638_v32 }
 0x376   :  { %v2825_v34 = vpop.f32.mrb[64].mxu0 }
 0x377   :  { %v2826_v38 = vpop.f32.mrb[65].mxu0 }
 0x378   :  { %v2827_v40 = vadd.f32 %v2826_v38, %v2825_v34  ;;  %v2828_v42 = vpop.f32.mrb[66].mxu0 }
 0x379   :  { %v2829_v43 = vpop.f32.mrb[67].mxu0 }
 0x37a   :  { %v2830_v44 = vadd.f32 %v2829_v43, %v2828_v42 }
 0x37c   :  { %v1272_v45 = vpack.c.bf16 %v2830_v44, %v2827_v40 }
 0x37e   :  { %v2831_v46 = vpop.f32.mrb[68].mxu0  ;;  %3289 = vmatprep.mubr.bf16.mxu1 %v1272_v45 }
 0x37f   :  { %v2832_v47 = vpop.f32.mrb[69].mxu0 }
 0x380   :  { %v2833_v48 = vadd.f32 %v2832_v47, %v2831_v46  ;;  %v2834_v49 = vpop.f32.mrb[70].mxu0 }
 0x381   :  { %v2835_v50 = vpop.f32.mrb[71].mxu0 }
 0x382   :  { %v2836_v52 = vadd.f32 %v2835_v50, %v2834_v49 }
 0x384   :  { %v1273_v53 = vpack.c.bf16 %v2836_v52, %v2833_v48 }
 0x386   :  { %v2837_v57 = vpop.f32.mrb[72].mxu0  ;;  %3290 = vmatmul.mubr.bf16.vlgmr.msra.gmra.mrb[32].mxu1 %v1273_v53 }
 0x387   :  { %v2838_v59 = vpop.f32.mrb[73].mxu0  ;;  %3322 = vmatpush3.bf16.msra.mxu1 %v3618_v36 }
 0x388   :  { %v2839_v60 = vadd.f32 %v2838_v59, %v2837_v57  ;;  %v2840_v61 = vpop.f32.mrb[74].mxu0  ;;  %3323 = vmatprep.subr.bf16.mxu1 %v3619_v56 }
 0x389   :  { %v2841_v63 = vpop.f32.mrb[75].mxu0 }
 0x38a   :  { %v2842_v37 = vadd.f32 %v2841_v63, %v2840_v61 }
 0x38b   :  { %3324 = vmatpush3.bf16.msra.mxu1 %v3619_v56 }
 0x38c   :  { %v1274_v22 = vpack.c.bf16 %v2842_v37, %v2839_v60  ;;  %3325 = vmatprep.subr.bf16.mxu1 %v3620_v62 }
 0x38e   :  { %v2843_v41 = vpop.f32.mrb[76].mxu0  ;;  %3293 = vmatprep.mubr.bf16.mxu1 %v1274_v22 }
 0x38f   :  { %v2844_v51 = vpop.f32.mrb[77].mxu0  ;;  %3326 = vmatpush3.bf16.msra.mxu1 %v3620_v62 }
 0x390   :  { %v2845_v54 = vadd.f32 %v2844_v51, %v2843_v41  ;;  %v2846_v55 = vpop.f32.mrb[78].mxu0  ;;  %3327 = vmatprep.subr.bf16.mxu1 %v3621_v35 }
 0x391   :  { %v2847_v2 = vpop.f32.mrb[79].mxu0 }
 0x392   :  { %v2848_v3 = vadd.f32 %v2847_v2, %v2846_v55 }
 0x393   :  { %3328 = vmatpush3.bf16.msra.mxu1 %v3621_v35 }
 0x394   :  { %v1275_v4 = vpack.c.bf16 %v2848_v3, %v2845_v54  ;;  %3329 = vmatprep.subr.bf16.mxu1 %v3622_v1 }
 0x396   :  { %v2849_v0 = vpop.f32.mrb[80].mxu0  ;;  %3294 = vmatmul.mubr.bf16.gmra.mrb[36].mxu1 %v1275_v4 }
 0x397   :  { %v2850_v6 = vpop.f32.mrb[81].mxu0  ;;  %3330 = vmatpush3.bf16.msra.mxu1 %v3622_v1 }
 0x398   :  { %v2851_v7 = vadd.f32 %v2850_v6, %v2849_v0  ;;  %v2852_v58 = vpop.f32.mrb[82].mxu0  ;;  %3331 = vmatprep.subr.bf16.mxu1 %v3623_v5 }
 0x399   :  { %v2853_v8 = vpop.f32.mrb[83].mxu0 }
 0x39a   :  { %v2854_v10 = vadd.f32 %v2853_v8, %v2852_v58 }
 0x39b   :  { %3332 = vmatpush3.bf16.msra.mxu1 %v3623_v5 }
 0x39c   :  { %v1276_v12 = vpack.c.bf16 %v2854_v10, %v2851_v7  ;;  %v3624_v7 = vld [vmem:[#allocation8 + $0xb0] sm:$0xff]   ;;  %v3625_v10 = vld [vmem:[#allocation8 + $0xb8] sm:$0xff]  }
 0x39d   :  { %3333 = vmatprep.subr.bf16.mxu1 %v3624_v7 }
 0x39e   :  { %v2855_v13 = vpop.f32.mrb[84].mxu0  ;;  %3297 = vmatprep.mubr.bf16.mxu1 %v1276_v12 }
 0x39f   :  { %v2856_v14 = vpop.f32.mrb[85].mxu0  ;;  %3334 = vmatpush3.bf16.msra.mxu1 %v3624_v7 }
 0x3a0   :  { %v2857_v17 = vadd.f32 %v2856_v14, %v2855_v13  ;;  %v2858_v11 = vpop.f32.mrb[86].mxu0  ;;  %3335 = vmatprep.subr.bf16.mxu1 %v3625_v10 }
 0x3a1   :  { %v2859_v18 = vpop.f32.mrb[87].mxu0 }
 0x3a2   :  { %v2860_v19 = vadd.f32 %v2859_v18, %v2858_v11 }
 0x3a3   :  { %3336 = vmatpush3.bf16.msra.mxu1 %v3625_v10 }
 0x3a4   :  { %v1277_v20 = vpack.c.bf16 %v2860_v19, %v2857_v17 }
 0x3a6   :  { %v2861_v16 = vpop.f32.mrb[88].mxu0  ;;  %3298 = vmatmul.mubr.bf16.gmra.mrb[40].mxu1 %v1277_v20 }
 0x3a7   :  { %v2862_v21 = vpop.f32.mrb[89].mxu0 }
 0x3a8   :  { %v2863_v25 = vadd.f32 %v2862_v21, %v2861_v16  ;;  %v2864_v15 = vpop.f32.mrb[90].mxu0 }
 0x3a9   :  { %v2865_v27 = vpop.f32.mrb[91].mxu0 }
 0x3aa   :  { %v2866_v29 = vadd.f32 %v2865_v27, %v2864_v15 }
 0x3ac   :  { %v1278_v23 = vpack.c.bf16 %v2866_v29, %v2863_v25 }
 0x3ae   :  { %v2867_v24 = vpop.f32.mrb[92].mxu0  ;;  %3301 = vmatprep.mubr.bf16.mxu1 %v1278_v23 }
 0x3af   :  { %v2868_v26 = vpop.f32.mrb[93].mxu0 }
 0x3b0   :  { %v2869_v28 = vadd.f32 %v2868_v26, %v2867_v24  ;;  %v2870_v30 = vpop.f32.mrb[94].mxu0 }
 0x3b1   :  { %v2871_v32 = vpop.f32.mrb[95].mxu0 }
 0x3b2   :  { %v2872_v34 = vadd.f32 %v2871_v32, %v2870_v30 }
 0x3b4   :  { %v1279_v36 = vpack.c.bf16 %v2872_v34, %v2869_v28  ;;  %v4146_v34 = vld [vmem:[%s4272_s4 + $0x1] ss:$0 sm:$0xff] }
 0x3b6   :  { %v2873_v38 = vpop.f32.mrb[96].mxu0  ;;  %3302 = vmatmul.mubr.bf16.gmra.mrb[44].mxu1 %v1279_v36 }
 0x3b7   :  { %v2874_v40 = vpop.f32.mrb[97].mxu0 }
 0x3b8   :  { %v2875_v42 = vadd.f32 %v2874_v40, %v2873_v38  ;;  %v2876_v43 = vpop.f32.mrb[98].mxu0 }
 0x3b9   :  { %v2877_v44 = vpop.f32.mrb[99].mxu0 }
 0x3ba   :  { %v2878_v45 = vadd.f32 %v2877_v44, %v2876_v43 }
 0x3bc   :  { %v1280_v46 = vpack.c.bf16 %v2878_v45, %v2875_v42 }
 0x3be   :  { %v2879_v47 = vpop.f32.mrb[100].mxu0  ;;  %3305 = vmatprep.mubr.bf16.mxu1 %v1280_v46 }
 0x3bf   :  { %v2880_v48 = vpop.f32.mrb[101].mxu0 }
 0x3c0   :  { %v2881_v49 = vadd.f32 %v2880_v48, %v2879_v47  ;;  %v2882_v50 = vpop.f32.mrb[102].mxu0 }
 0x3c1   :  { %v2883_v52 = vpop.f32.mrb[103].mxu0 }
 0x3c2   :  { %v2884_v53 = vadd.f32 %v2883_v52, %v2882_v50 }
 0x3c4   :  { %v1281_v56 = vpack.c.bf16 %v2884_v53, %v2881_v49 }
 0x3c6   :  { %3306 = vmatmul.mubr.bf16.gmra.mrb[48].mxu1 %v1281_v56  ;;  %v2885_v57 = vpop.f32.mrb[104].mxu0 }
 0x3c7   :  { %v2886_v59 = vpop.f32.mrb[105].mxu0 }
 0x3c8   :  { %v2887_v60 = vadd.f32 %v2886_v59, %v2885_v57  ;;  %v2888_v61 = vpop.f32.mrb[106].mxu0 }
 0x3c9   :  { %v2889_v62 = vpop.f32.mrb[107].mxu0 }
 0x3ca   :  { %v2890_v63 = vadd.f32 %v2889_v62, %v2888_v61 }
 0x3cc   :  { %v1282_v37 = vpack.c.bf16 %v2890_v63, %v2887_v60 }
 0x3ce   :  { %v2891_v22 = vpop.f32.mrb[108].mxu0  ;;  %3309 = vmatprep.mubr.bf16.mxu1 %v1282_v37 }
 0x3cf   :  { %v2892_v35 = vpop.f32.mrb[109].mxu0 }
 0x3d0   :  { %v2893_v41 = vadd.f32 %v2892_v35, %v2891_v22  ;;  %v2894_v51 = vpop.f32.mrb[110].mxu0 }
 0x3d1   :  { %v2895_v54 = vpop.f32.mrb[111].mxu0 }
 0x3d2   :  { %v2896_v55 = vadd.f32 %v2895_v54, %v2894_v51 }
 0x3d4   :  { %v1283_v1 = vpack.c.bf16 %v2896_v55, %v2893_v41 }
 0x3d6   :  { %3310 = vmatmul.mubr.bf16.gmra.mrb[52].mxu1 %v1283_v1  ;;  %v2897_v2 = vpop.f32.mrb[112].mxu0 }
 0x3d7   :  { %v2898_v3 = vpop.f32.mrb[113].mxu0 }
 0x3d8   :  { %v2899_v4 = vadd.f32 %v2898_v3, %v2897_v2  ;;  %v2900_v5 = vpop.f32.mrb[114].mxu0 }
 0x3d9   :  { %v2901_v0 = vpop.f32.mrb[115].mxu0 }
 0x3da   :  { %v2902_v6 = vadd.f32 %v2901_v0, %v2900_v5 }
 0x3dc   :  { %v1284_v58 = vpack.c.bf16 %v2902_v6, %v2899_v4 }
 0x3de   :  { %v2903_v8 = vpop.f32.mrb[116].mxu0  ;;  %3313 = vmatprep.mubr.bf16.mxu1 %v1284_v58 }
 0x3df   :  { %v2904_v12 = vpop.f32.mrb[117].mxu0 }
 0x3e0   :  { %v2905_v13 = vadd.f32 %v2904_v12, %v2903_v8  ;;  %v2906_v14 = vpop.f32.mrb[118].mxu0 }
 0x3e1   :  { %v2907_v17 = vpop.f32.mrb[119].mxu0 }
 0x3e2   :  { %v2908_v11 = vadd.f32 %v2907_v17, %v2906_v14 }
 0x3e4   :  { %v1285_v18 = vpack.c.bf16 %v2908_v11, %v2905_v13 }
 0x3e6   :  { %3314 = vmatmul.mubr.bf16.gmra.mrb[56].mxu1 %v1285_v18  ;;  %v2909_v19 = vpop.f32.mrb[120].mxu0 }
 0x3e7   :  { %v2910_v20 = vpop.f32.mrb[121].mxu0 }
 0x3e8   :  { %v2911_v16 = vadd.f32 %v2910_v20, %v2909_v19  ;;  %v2912_v21 = vpop.f32.mrb[122].mxu0 }
 0x3e9   :  { %v2913_v25 = vpop.f32.mrb[123].mxu0 }
 0x3ea   :  { %v2914_v15 = vadd.f32 %v2913_v25, %v2912_v21 }
 0x3ec   :  { %v1286_v27 = vpack.c.bf16 %v2914_v15, %v2911_v16 }
 0x3ee   :  { %v2915_v29 = vpop.f32.mrb[124].mxu0  ;;  %3317 = vmatprep.mubr.bf16.mxu1 %v1286_v27 }
 0x3ef   :  { %v2916_v23 = vpop.f32.mrb[125].mxu0 }
 0x3f0   :  { %v2917_v24 = vadd.f32 %v2916_v23, %v2915_v29  ;;  %v2918_v26 = vpop.f32.mrb[126].mxu0 }
 0x3f1   :  { %v2919_v28 = vpop.f32.mrb[127].mxu0 }
 0x3f2   :  { %v2920_v30 = vadd.f32 %v2919_v28, %v2918_v26 }
 0x3f4   :  { %v1287_v32 = vpack.c.bf16 %v2920_v30, %v2917_v24 }
 0x3f6   :  { %3318 = vmatmul.mubr.bf16.gmra.mrb[60].mxu1 %v1287_v32 }
 0x459   :  { %v3291_v36 = vpop.f32.mrb[32].mxu1 }
 0x45a   :  { %v1750_v38 = vadd.f32 %v3291_v36, %v4146_v34  ;;  %v1613_v40 = vpop.f32.mrb[33].mxu1 }
 0x45b   :  { %v1748_v42 = vadd.f32 %v4146_v34, %v1613_v40  ;;  %v3292_v43 = vpop.f32.mrb[34].mxu1 }
 0x45c   :  { %v1751_v44 = vadd.f32 %v3292_v43, %v4146_v34  ;;  %v1616_v45 = vpop.f32.mrb[35].mxu1  ;;  %v1782_v47 = vmax.f32 %v1750_v38, 0.0 }
 0x45d   :  { %v1749_v46 = vadd.f32 %v4146_v34, %v1616_v45  ;;  %v1780_v49 = vmax.f32 %v1748_v42, 0.0 }
 0x45e   :  { %v1783_v48 = vmax.f32 %v1751_v44, 0.0 }
 0x45f   :  { %v1781_v50 = vmax.f32 %v1749_v46, 0.0 }
 0x460   :  { %v4152_v52 = vpack.c.bf16 %v1783_v48, %v1782_v47 }
 0x461   :  { %v4154_v53 = vpack.c.bf16 %v1781_v50, %v1780_v49 }
 0x463   :  { %3337 = vmatprep.mubr.bf16.mxu1 %v4154_v53 }
 0x464   :  { %3338 = vmatmul.mubr.bf16.vlgmr.msra.gmra.mrb[64].mxu1 %v4152_v52 }
 0x469   :  { %v3295_v56 = vpop.f32.mrb[36].mxu1 }
 0x46a   :  { %v1754_v57 = vadd.f32 %v3295_v56, %v4146_v34  ;;  %v1629_v59 = vpop.f32.mrb[37].mxu1 }
 0x46b   :  { %v1752_v60 = vadd.f32 %v4146_v34, %v1629_v59  ;;  %v3296_v61 = vpop.f32.mrb[38].mxu1 }
 0x46c   :  { %v1755_v62 = vadd.f32 %v3296_v61, %v4146_v34  ;;  %v1632_v63 = vpop.f32.mrb[39].mxu1  ;;  %v1786_v22 = vmax.f32 %v1754_v57, 0.0 }
 0x46d   :  { %v1753_v37 = vadd.f32 %v4146_v34, %v1632_v63  ;;  %v1784_v41 = vmax.f32 %v1752_v60, 0.0 }
 0x46e   :  { %v1787_v35 = vmax.f32 %v1755_v62, 0.0 }
 0x46f   :  { %v1785_v51 = vmax.f32 %v1753_v37, 0.0 }
 0x470   :  { %v4162_v54 = vpack.c.bf16 %v1787_v35, %v1786_v22 }
 0x471   :  { %v4164_v55 = vpack.c.bf16 %v1785_v51, %v1784_v41 }
 0x473   :  { %3341 = vmatprep.mubr.bf16.mxu1 %v4164_v55 }
 0x474   :  { %3342 = vmatmul.mubr.bf16.gmra.mrb[68].mxu1 %v4162_v54 }
 0x479   :  { %v3299_v1 = vpop.f32.mrb[40].mxu1 }
 0x47a   :  { %v1758_v2 = vadd.f32 %v3299_v1, %v4146_v34  ;;  %v1645_v3 = vpop.f32.mrb[41].mxu1 }
 0x47b   :  { %v1756_v4 = vadd.f32 %v4146_v34, %v1645_v3  ;;  %v3300_v5 = vpop.f32.mrb[42].mxu1 }
 0x47c   :  { %v1759_v0 = vadd.f32 %v3300_v5, %v4146_v34  ;;  %v1648_v6 = vpop.f32.mrb[43].mxu1  ;;  %v1790_v58 = vmax.f32 %v1758_v2, 0.0 }
 0x47d   :  { %v1757_v7 = vadd.f32 %v4146_v34, %v1648_v6  ;;  %v1788_v10 = vmax.f32 %v1756_v4, 0.0 }
 0x47e   :  { %v1791_v8 = vmax.f32 %v1759_v0, 0.0 }
 0x47f   :  { %v1789_v12 = vmax.f32 %v1757_v7, 0.0 }
 0x480   :  { %v4172_v13 = vpack.c.bf16 %v1791_v8, %v1790_v58 }
 0x481   :  { %v4174_v14 = vpack.c.bf16 %v1789_v12, %v1788_v10 }
 0x483   :  { %3345 = vmatprep.mubr.bf16.mxu1 %v4174_v14 }
 0x484   :  { %3346 = vmatmul.mubr.bf16.gmra.mrb[72].mxu1 %v4172_v13 }
 0x489   :  { %v3303_v17 = vpop.f32.mrb[44].mxu1 }
 0x48a   :  { %v1762_v11 = vadd.f32 %v3303_v17, %v4146_v34  ;;  %v1661_v18 = vpop.f32.mrb[45].mxu1 }
 0x48b   :  { %v1760_v19 = vadd.f32 %v4146_v34, %v1661_v18  ;;  %v3304_v20 = vpop.f32.mrb[46].mxu1 }
 0x48c   :  { %v1763_v16 = vadd.f32 %v3304_v20, %v4146_v34  ;;  %v1664_v21 = vpop.f32.mrb[47].mxu1  ;;  %v1794_v15 = vmax.f32 %v1762_v11, 0.0 }
 0x48d   :  { %v1761_v25 = vadd.f32 %v4146_v34, %v1664_v21  ;;  %v1792_v29 = vmax.f32 %v1760_v19, 0.0 }
 0x48e   :  { %v1795_v27 = vmax.f32 %v1763_v16, 0.0 }
 0x48f   :  { %v1793_v23 = vmax.f32 %v1761_v25, 0.0 }
 0x490   :  { %v4182_v24 = vpack.c.bf16 %v1795_v27, %v1794_v15 }
 0x491   :  { %v4184_v26 = vpack.c.bf16 %v1793_v23, %v1792_v29 }
 0x493   :  { %3349 = vmatprep.mubr.bf16.mxu1 %v4184_v26 }
 0x494   :  { %3350 = vmatmul.mubr.bf16.gmra.mrb[76].mxu1 %v4182_v24 }
 0x499   :  { %v3307_v28 = vpop.f32.mrb[48].mxu1 }
 0x49a   :  { %v1766_v30 = vadd.f32 %v3307_v28, %v4146_v34  ;;  %v1677_v32 = vpop.f32.mrb[49].mxu1  ;;  %v3627_v28 = vld [vmem:[#allocation7 + $0x88] sm:$0xff]  }
 0x49b   :  { %v1764_v36 = vadd.f32 %v4146_v34, %v1677_v32  ;;  %v3308_v38 = vpop.f32.mrb[50].mxu1  ;;  %v3630_v32 = vld [vmem:[#allocation7 + $0xa0] sm:$0xff]  }
 0x49c   :  { %v1767_v40 = vadd.f32 %v3308_v38, %v4146_v34  ;;  %v1680_v42 = vpop.f32.mrb[51].mxu1  ;;  %v1798_v44 = vmax.f32 %v1766_v30, 0.0  ;;  %v3628_v30 = vld [vmem:[#allocation7 + $0x90] sm:$0xff]   ;;  %v3643_v38 = vld [vmem:[#allocation2 + $0x40] ss:$8 sps:$4 sm:$0xff]  }
 0x49d   :  { %v1765_v43 = vadd.f32 %v4146_v34, %v1680_v42  ;;  %v1796_v46 = vmax.f32 %v1764_v36, 0.0  ;;  %v3641_v36 = vld [vmem:[#allocation2 + $0x30] ss:$8 sps:$4 sm:$0xff]   ;;  %v3646_v42 = vld [vmem:[#allocation2 + $0x64] ss:$8 sps:$4 sm:$0xff]  }
 0x49e   :  { %v1799_v45 = vmax.f32 %v1767_v40, 0.0  ;;  %v3645_v40 = vld [vmem:[#allocation2 + $0x50] ss:$8 sps:$4 sm:$0xff]  }
 0x49f   :  { %v1797_v47 = vmax.f32 %v1765_v43, 0.0  ;;  %v3649_v43 = vld [vmem:[#allocation2 + $0x70] ss:$8 sps:$4 sm:$0xff]  }
 0x4a0   :  { %v1821_v48 = vpack.c.bf16 %v1799_v45, %v1798_v44  ;;  %v3650_v44 = vld [vmem:[#allocation2 + $0x84] ss:$8 sps:$4 sm:$0xff]   ;;  %v3651_v45 = vld [vmem:[#allocation2 + $0x80] ss:$8 sps:$4 sm:$0xff]  }
 0x4a1   :  { %v1820_v49 = vpack.c.bf16 %v1797_v47, %v1796_v46  ;;  %v3652_v46 = vld [vmem:[#allocation2 + $0x94] ss:$8 sps:$4 sm:$0xff]   ;;  %v3653_v47 = vld [vmem:[#allocation2 + $0x90] ss:$8 sps:$4 sm:$0xff]  }
 0x4a3   :  { %2969 = vmatprep.subr.bf16.mxu0 %v1820_v49  ;;  %3353 = vmatprep.mubr.bf16.mxu1 %v1820_v49  ;;  %v3655_v49 = vld [vmem:[#allocation2 + $0xa0] ss:$8 sps:$4 sm:$0xff]  }
 0x4a4   :  { %2970 = vmatpush3.bf16.msra.mxu0 %v4154_v53  ;;  %3354 = vmatmul.mubr.bf16.gmra.mrb[80].mxu1 %v1821_v48 }
 0x4a5   :  { %2971 = vmatprep.subr.bf16.mxu0 %v1821_v48  ;;  %v3654_v48 = vld [vmem:[#allocation2 + $0xa4] ss:$8 sps:$4 sm:$0xff]  }
 0x4a8   :  { %2972 = vmatpush3.bf16.msra.mxu0 %v4152_v52 }
 0x4a9   :  { %v3311_v50 = vpop.f32.mrb[52].mxu1 }
 0x4aa   :  { %v1770_v56 = vadd.f32 %v3311_v50, %v4146_v34  ;;  %v1693_v57 = vpop.f32.mrb[53].mxu1  ;;  %v3656_v50 = vld [vmem:[#allocation2 + $0xb4] ss:$8 sps:$4 sm:$0xff]  }
 0x4ab   :  { %v1768_v59 = vadd.f32 %v4146_v34, %v1693_v57  ;;  %v3312_v60 = vpop.f32.mrb[54].mxu1  ;;  %v3657_v57 = vld [vmem:[#allocation2 + $0xb0] ss:$8 sps:$4 sm:$0xff]  }
 0x4ac   :  { %v1771_v61 = vadd.f32 %v3312_v60, %v4146_v34  ;;  %v1696_v62 = vpop.f32.mrb[55].mxu1  ;;  %v1802_v37 = vmax.f32 %v1770_v56, 0.0  ;;  %v3631_v56 = vld [vmem:[#allocation7 + $0xa8] sm:$0xff]   ;;  %v3632_v60 = vld [vmem:[#allocation7 + $0xb0] sm:$0xff]  }
 0x4ad   :  { %v1769_v63 = vadd.f32 %v4146_v34, %v1696_v62  ;;  %v1800_v35 = vmax.f32 %v1768_v59, 0.0  ;;  %v3658_v59 = vld [vmem:[#allocation2 + $0xc4] ss:$8 sps:$4 sm:$0xff]   ;;  %v3659_v62 = vld [vmem:[#allocation2 + $0xc0] ss:$8 sps:$4 sm:$0xff]  }
 0x4ae   :  { %v1803_v22 = vmax.f32 %v1771_v61, 0.0  ;;  %v3633_v61 = vld [vmem:[#allocation7 + $0xb8] sm:$0xff]  }
 0x4af   :  { %v1801_v53 = vmax.f32 %v1769_v63, 0.0  ;;  %v3660_v63 = vld [vmem:[#allocation2 + $0xd4] ss:$8 sps:$4 sm:$0xff]  }
 0x4b0   :  { %v1823_v41 = vpack.c.bf16 %v1803_v22, %v1802_v37  ;;  %v3661_v37 = vld [vmem:[#allocation2 + $0xd0] ss:$8 sps:$4 sm:$0xff]   ;;  %v3662_v22 = vld [vmem:[#allocation2 + $0xe4] ss:$8 sps:$4 sm:$0xff]  }
 0x4b1   :  { %v1822_v51 = vpack.c.bf16 %v1801_v53, %v1800_v35  ;;  %v3663_v35 = vld [vmem:[#allocation2 + $0xe0] ss:$8 sps:$4 sm:$0xff]   ;;  %v3664_v53 = vld [vmem:[#allocation2 + $0xf4] ss:$8 sps:$4 sm:$0xff]  }
 0x4b3   :  { %2973 = vmatprep.subr.bf16.mxu0 %v1822_v51  ;;  %3357 = vmatprep.mubr.bf16.mxu1 %v1822_v51 }
 0x4b4   :  { %2974 = vmatpush3.bf16.msra.mxu0 %v4164_v55  ;;  %3358 = vmatmul.mubr.bf16.gmra.mrb[84].mxu1 %v1823_v41 }
 0x4b5   :  { %2975 = vmatprep.subr.bf16.mxu0 %v1823_v41  ;;  %v3665_v41 = vld [vmem:[#allocation2 + $0xf0] ss:$8 sps:$4 sm:$0xff]  }
 0x4b8   :  { %2976 = vmatpush3.bf16.msra.mxu0 %v4162_v54 }
 0x4b9   :  { %v3315_v52 = vpop.f32.mrb[56].mxu1 }
 0x4ba   :  { %v1774_v1 = vadd.f32 %v3315_v52, %v4146_v34  ;;  %v1709_v2 = vpop.f32.mrb[57].mxu1 }
 0x4bb   :  { %v1772_v3 = vadd.f32 %v4146_v34, %v1709_v2  ;;  %v3316_v4 = vpop.f32.mrb[58].mxu1 }
 0x4bc   :  { %v1775_v5 = vadd.f32 %v3316_v4, %v4146_v34  ;;  %v1712_v0 = vpop.f32.mrb[59].mxu1  ;;  %v1806_v7 = vmax.f32 %v1774_v1, 0.0 }
 0x4bd   :  { %v1773_v6 = vadd.f32 %v4146_v34, %v1712_v0  ;;  %v1804_v8 = vmax.f32 %v1772_v3, 0.0 }
 0x4be   :  { %v1807_v58 = vmax.f32 %v1775_v5, 0.0 }
 0x4bf   :  { %v1805_v55 = vmax.f32 %v1773_v6, 0.0 }
 0x4c0   :  { %v1825_v10 = vpack.c.bf16 %v1807_v58, %v1806_v7 }
 0x4c1   :  { %v1824_v12 = vpack.c.bf16 %v1805_v55, %v1804_v8 }
 0x4c3   :  { %2977 = vmatprep.subr.bf16.mxu0 %v1824_v12  ;;  %3361 = vmatprep.mubr.bf16.mxu1 %v1824_v12 }
 0x4c4   :  { %2978 = vmatpush3.bf16.msra.mxu0 %v4174_v14  ;;  %3362 = vmatmul.mubr.bf16.gmra.mrb[88].mxu1 %v1825_v10 }
 0x4c5   :  { %2979 = vmatprep.subr.bf16.mxu0 %v1825_v10 }
 0x4c8   :  { %2980 = vmatpush3.bf16.msra.mxu0 %v4172_v13  ;;  %v3626_v13 = vld [vmem:[#allocation7 + $0x80] sm:$0xff]  }
 0x4c9   :  { %v3319_v54 = vpop.f32.mrb[60].mxu1  ;;  %3369 = vmatprep.subr.bf16.mxu1 %v3626_v13 }
 0x4ca   :  { %v1778_v17 = vadd.f32 %v3319_v54, %v4146_v34  ;;  %v1725_v11 = vpop.f32.mrb[61].mxu1  ;;  %3370 = vmatpush3.bf16.msra.mxu1 %v3626_v13 }
 0x4cb   :  { %v1776_v18 = vadd.f32 %v4146_v34, %v1725_v11  ;;  %v3320_v19 = vpop.f32.mrb[62].mxu1  ;;  %3371 = vmatprep.subr.bf16.mxu1 %v3627_v28 }
 0x4cc   :  { %v1779_v20 = vadd.f32 %v3320_v19, %v4146_v34  ;;  %v1728_v16 = vpop.f32.mrb[63].mxu1  ;;  %v1810_v25 = vmax.f32 %v1778_v17, 0.0 }
 0x4cd   :  { %v1777_v21 = vadd.f32 %v4146_v34, %v1728_v16  ;;  %v1808_v27 = vmax.f32 %v1776_v18, 0.0  ;;  %v3629_v34 = vld [vmem:[#allocation7 + $0x98] sm:$0xff]  }
 0x4ce   :  { %v1811_v15 = vmax.f32 %v1779_v20, 0.0  ;;  %3372 = vmatpush3.bf16.msra.mxu1 %v3627_v28 }
 0x4cf   :  { %v1809_v14 = vmax.f32 %v1777_v21, 0.0  ;;  %3373 = vmatprep.subr.bf16.mxu1 %v3628_v30 }
 0x4d0   :  { %v1827_v29 = vpack.c.bf16 %v1811_v15, %v1810_v25 }
 0x4d1   :  { %v1826_v23 = vpack.c.bf16 %v1809_v14, %v1808_v27 }
 0x4d2   :  { %3374 = vmatpush3.bf16.msra.mxu1 %v3628_v30 }
 0x4d3   :  { %2981 = vmatprep.subr.bf16.mxu0 %v1826_v23  ;;  %3365 = vmatprep.mubr.bf16.mxu1 %v1826_v23 }
 0x4d4   :  { %2982 = vmatpush3.bf16.msra.mxu0 %v4184_v26  ;;  %3366 = vmatmul.mubr.bf16.gmra.mrb[92].mxu1 %v1827_v29  ;;  %v3639_v26 = vld [vmem:[#allocation2 + $0x20] ss:$8 sps:$4 sm:$0xff]  }
 0x4d5   :  { %2983 = vmatprep.subr.bf16.mxu0 %v1827_v29  ;;  %3375 = vmatprep.subr.bf16.mxu1 %v3629_v34 }
 0x4d6   :  { %3376 = vmatpush3.bf16.msra.mxu1 %v3629_v34 }
 0x4d7   :  { %3377 = vmatprep.subr.bf16.mxu1 %v3630_v32 }
 0x4d8   :  { %2984 = vmatpush3.bf16.msra.mxu0 %v4182_v24  ;;  %v3640_v24 = vld [vmem:[#allocation2 + $0x34] ss:$8 sps:$4 sm:$0xff]  }
 0x4da   :  { %3378 = vmatpush3.bf16.msra.mxu1 %v3630_v32 }
 0x4db   :  { %1861 = vmatmul.mubr.bf16.vlgmr.msra.gmra.mrb[128].mxu0 %v4104_v9  ;;  %v3642_v9 = vld [vmem:[#allocation2 + $0x44] ss:$8 sps:$4 sm:$0xff]   ;;  %3379 = vmatprep.subr.bf16.mxu1 %v3631_v56 }
 0x4dc   :  { %1868 = vmatprep.mubr.bf16.mxu0 %v4107_v31  ;;  %v3644_v31 = vld [vmem:[#allocation2 + $0x54] ss:$8 sps:$4 sm:$0xff]  }
 0x4de   :  { %3380 = vmatpush3.bf16.msra.mxu1 %v3631_v56 }
 0x4df   :  { %3381 = vmatprep.subr.bf16.mxu1 %v3632_v60 }
 0x4e2   :  { %3382 = vmatpush3.bf16.msra.mxu1 %v3632_v60 }
 0x4e3   :  { %1869 = vmatmul.mubr.bf16.gmra.mrb[132].mxu0 %v4110_v39  ;;  %v3647_v39 = vld [vmem:[#allocation2 + $0x60] ss:$8 sps:$4 sm:$0xff]   ;;  %3383 = vmatprep.subr.bf16.mxu1 %v3633_v61 }
 0x4e4   :  { %1876 = vmatprep.mubr.bf16.mxu0 %v4113_v33  ;;  %v3648_v33 = vld [vmem:[#allocation2 + $0x74] ss:$8 sps:$4 sm:$0xff]  }
 0x4e6   :  { %3384 = vmatpush3.bf16.msra.mxu1 %v3633_v61 }
 0x4eb   :  { %1877 = vmatmul.mubr.bf16.gmra.mrb[136].mxu0 %v3639_v26 }
 0x4ec   :  { %1884 = vmatprep.mubr.bf16.mxu0 %v3640_v24 }
 0x4f3   :  { %1885 = vmatmul.mubr.bf16.gmra.mrb[140].mxu0 %v3641_v36 }
 0x4f4   :  { %1892 = vmatprep.mubr.bf16.mxu0 %v3642_v9 }
 0x4fb   :  { %1893 = vmatmul.mubr.bf16.gmra.mrb[144].mxu0 %v3643_v38 }
 0x4fc   :  { %1900 = vmatprep.mubr.bf16.mxu0 %v3644_v31 }
 0x503   :  { %1901 = vmatmul.mubr.bf16.gmra.mrb[148].mxu0 %v3645_v40 }
 0x504   :  { %1908 = vmatprep.mubr.bf16.mxu0 %v3646_v42 }
 0x50b   :  { %1909 = vmatmul.mubr.bf16.gmra.mrb[152].mxu0 %v3647_v39 }
 0x50c   :  { %1916 = vmatprep.mubr.bf16.mxu0 %v3648_v33 }
 0x513   :  { %1917 = vmatmul.mubr.bf16.gmra.mrb[156].mxu0 %v3649_v43 }
 0x514   :  { %1924 = vmatprep.mubr.bf16.mxu0 %v3650_v44 }
 0x51b   :  { %1925 = vmatmul.mubr.bf16.gmra.mrb[160].mxu0 %v3651_v45 }
 0x51c   :  { %1932 = vmatprep.mubr.bf16.mxu0 %v3652_v46 }
 0x523   :  { %1933 = vmatmul.mubr.bf16.gmra.mrb[164].mxu0 %v3653_v47 }
 0x524   :  { %1940 = vmatprep.mubr.bf16.mxu0 %v3654_v48 }
 0x52b   :  { %1941 = vmatmul.mubr.bf16.gmra.mrb[168].mxu0 %v3655_v49 }
 0x52c   :  { %1948 = vmatprep.mubr.bf16.mxu0 %v3656_v50 }
 0x533   :  { %1949 = vmatmul.mubr.bf16.gmra.mrb[172].mxu0 %v3657_v57 }
 0x534   :  { %1956 = vmatprep.mubr.bf16.mxu0 %v3658_v59 }
 0x53b   :  { %1957 = vmatmul.mubr.bf16.gmra.mrb[176].mxu0 %v3659_v62 }
 0x53c   :  { %1964 = vmatprep.mubr.bf16.mxu0 %v3660_v63 }
 0x543   :  { %1965 = vmatmul.mubr.bf16.gmra.mrb[180].mxu0 %v3661_v37 }
 0x544   :  { %1972 = vmatprep.mubr.bf16.mxu0 %v3662_v22 }
 0x54b   :  { %1973 = vmatmul.mubr.bf16.gmra.mrb[184].mxu0 %v3663_v35 }
 0x54c   :  { %1980 = vmatprep.mubr.bf16.mxu0 %v3664_v53 }
 0x553   :  { %1981 = vmatmul.mubr.bf16.gmra.mrb[188].mxu0 %v3665_v41 }
 0x5ae   :  { %v2985_v51 = vpop.f32.mrb[128].mxu0 }
 0x5af   :  { %v2986_v52 = vpop.f32.mrb[129].mxu0 }
 0x5b0   :  { %v2987_v1 = vadd.f32 %v2986_v52, %v2985_v51  ;;  %v2988_v2 = vpop.f32.mrb[130].mxu0 }
 0x5b1   :  { %v2989_v3 = vpop.f32.mrb[131].mxu0 }
 0x5b2   :  { %v2990_v4 = vadd.f32 %v2989_v3, %v2988_v2 }
 0x5b4   :  { %v1989_v5 = vpack.c.bf16 %v2990_v4, %v2987_v1 }
 0x5b6   :  { %v2991_v0 = vpop.f32.mrb[132].mxu0  ;;  %3385 = vmatprep.mubr.bf16.mxu1 %v1989_v5 }
 0x5b7   :  { %v2992_v6 = vpop.f32.mrb[133].mxu0 }
 0x5b8   :  { %v2993_v7 = vadd.f32 %v2992_v6, %v2991_v0  ;;  %v2994_v58 = vpop.f32.mrb[134].mxu0 }
 0x5b9   :  { %v2995_v8 = vpop.f32.mrb[135].mxu0 }
 0x5ba   :  { %v2996_v55 = vadd.f32 %v2995_v8, %v2994_v58 }
 0x5bc   :  { %v1990_v10 = vpack.c.bf16 %v2996_v55, %v2993_v7 }
 0x5be   :  { %3386 = vmatmul.mubr.bf16.vlgmr.msra.gmra.mrb[64].mxu1 %v1990_v10  ;;  %v2997_v12 = vpop.f32.mrb[136].mxu0 }
 0x5bf   :  { %v2998_v54 = vpop.f32.mrb[137].mxu0 }
 0x5c0   :  { %v2999_v17 = vadd.f32 %v2998_v54, %v2997_v12  ;;  %v3000_v11 = vpop.f32.mrb[138].mxu0 }
 0x5c1   :  { %v3001_v18 = vpop.f32.mrb[139].mxu0 }
 0x5c2   :  { %v3002_v19 = vadd.f32 %v3001_v18, %v3000_v11 }
 0x5c4   :  { %v1991_v20 = vpack.c.bf16 %v3002_v19, %v2999_v17 }
 0x5c6   :  { %v3003_v16 = vpop.f32.mrb[140].mxu0  ;;  %3389 = vmatprep.mubr.bf16.mxu1 %v1991_v20 }
 0x5c7   :  { %v3004_v21 = vpop.f32.mrb[141].mxu0 }
 0x5c8   :  { %v3005_v25 = vadd.f32 %v3004_v21, %v3003_v16  ;;  %v3006_v15 = vpop.f32.mrb[142].mxu0 }
 0x5c9   :  { %v3007_v27 = vpop.f32.mrb[143].mxu0 }
 0x5ca   :  { %v3008_v14 = vadd.f32 %v3007_v27, %v3006_v15 }
 0x5cc   :  { %v1992_v29 = vpack.c.bf16 %v3008_v14, %v3005_v25 }
 0x5ce   :  { %3390 = vmatmul.mubr.bf16.gmra.mrb[68].mxu1 %v1992_v29  ;;  %v3009_v23 = vpop.f32.mrb[144].mxu0 }
 0x5cf   :  { %v3010_v13 = vpop.f32.mrb[145].mxu0 }
 0x5d0   :  { %v3011_v28 = vadd.f32 %v3010_v13, %v3009_v23  ;;  %v3012_v30 = vpop.f32.mrb[146].mxu0 }
 0x5d1   :  { %v3013_v34 = vpop.f32.mrb[147].mxu0 }
 0x5d2   :  { %v3014_v32 = vadd.f32 %v3013_v34, %v3012_v30 }
 0x5d4   :  { %v1993_v26 = vpack.c.bf16 %v3014_v32, %v3011_v28 }
 0x5d6   :  { %v3015_v24 = vpop.f32.mrb[148].mxu0  ;;  %3393 = vmatprep.mubr.bf16.mxu1 %v1993_v26 }
 0x5d7   :  { %v3016_v36 = vpop.f32.mrb[149].mxu0 }
 0x5d8   :  { %v3017_v9 = vadd.f32 %v3016_v36, %v3015_v24  ;;  %v3018_v38 = vpop.f32.mrb[150].mxu0 }
 0x5d9   :  { %v3019_v31 = vpop.f32.mrb[151].mxu0 }
 0x5da   :  { %v3020_v40 = vadd.f32 %v3019_v31, %v3018_v38 }
 0x5dc   :  { %v1994_v42 = vpack.c.bf16 %v3020_v40, %v3017_v9 }
 0x5de   :  { %3394 = vmatmul.mubr.bf16.gmra.mrb[72].mxu1 %v1994_v42  ;;  %v3021_v39 = vpop.f32.mrb[152].mxu0 }
 0x5df   :  { %v3022_v33 = vpop.f32.mrb[153].mxu0 }
 0x5e0   :  { %v3023_v43 = vadd.f32 %v3022_v33, %v3021_v39  ;;  %v3024_v44 = vpop.f32.mrb[154].mxu0 }
 0x5e1   :  { %v3025_v45 = vpop.f32.mrb[155].mxu0 }
 0x5e2   :  { %v3026_v46 = vadd.f32 %v3025_v45, %v3024_v44 }
 0x5e4   :  { %v1995_v47 = vpack.c.bf16 %v3026_v46, %v3023_v43 }
 0x5e6   :  { %v3027_v48 = vpop.f32.mrb[156].mxu0  ;;  %3397 = vmatprep.mubr.bf16.mxu1 %v1995_v47  ;;  %v4219_v47 = vld [vmem:[%s4272_s4 + $0x2] ss:$0 sm:$0xff]  ;;  %s3792_s4 = smov [#allocation10]  }
 0x5e7   :  { %v3028_v49 = vpop.f32.mrb[157].mxu0  ;;  %s2534_s23 = sshll.u32 %s3792_s4, 4  ;;  %s2535_s23 = int_to_ptr.vmem [resolvable:$true] %s2534_s23 }
 0x5e8   :  { %v3029_v50 = vadd.f32 %v3028_v49, %v3027_v48  ;;  %v3030_v56 = vpop.f32.mrb[158].mxu0  ;;  %s3754_s24 = scalar_lea.vmem %s2535_s23, 4096  ;;  %p3759_p5 = scmp.lt.s32.totalorder %s2535_s23, %s2535_s23 }
 0x5e9   :  { %v3031_v57 = vpop.f32.mrb[159].mxu0  ;;  %p3755_p4 = scmp.ne.s32.totalorder %s2535_s23, %s3754_s24  ;;  %p3760_p6 = scmp.lt.s32.totalorder %s3754_s24, %s3754_s24 }
 0x5ea   :  { %v3032_v59 = vadd.f32 %v3031_v57, %v3030_v56 }
 0x5eb   :  { %p3761_p7 = por %p3760_p6, %p3759_p5 }
 0x5ec   :  { %v1996_v60 = vpack.c.bf16 %v3032_v59, %v3029_v50 }
 0x5ed   :  { %p3762_p8 = pnand %p3761_p7, %p3755_p4 }
 0x5ee   :  { %3398 = vmatmul.mubr.bf16.gmra.mrb[76].mxu1 %v1996_v60  ;;  %v3033_v61 = vpop.f32.mrb[160].mxu0 }
 0x5ef   :  { %v3034_v62 = vpop.f32.mrb[161].mxu0 }
 0x5f0   :  { %v3035_v63 = vadd.f32 %v3034_v62, %v3033_v61  ;;  %v3036_v37 = vpop.f32.mrb[162].mxu0 }
 0x5f1   :  { %v3037_v22 = vpop.f32.mrb[163].mxu0 }
 0x5f2   :  { %v3038_v35 = vadd.f32 %v3037_v22, %v3036_v37 }
 0x5f4   :  { %v1997_v53 = vpack.c.bf16 %v3038_v35, %v3035_v63 }
 0x5f6   :  { %v3039_v41 = vpop.f32.mrb[164].mxu0  ;;  %3401 = vmatprep.mubr.bf16.mxu1 %v1997_v53 }
 0x5f7   :  { %v3040_v51 = vpop.f32.mrb[165].mxu0 }
 0x5f8   :  { %v3041_v52 = vadd.f32 %v3040_v51, %v3039_v41  ;;  %v3042_v1 = vpop.f32.mrb[166].mxu0 }
 0x5f9   :  { %v3043_v2 = vpop.f32.mrb[167].mxu0 }
 0x5fa   :  { %v3044_v3 = vadd.f32 %v3043_v2, %v3042_v1 }
 0x5fc   :  { %v1998_v4 = vpack.c.bf16 %v3044_v3, %v3041_v52 }
 0x5fe   :  { %3402 = vmatmul.mubr.bf16.gmra.mrb[80].mxu1 %v1998_v4  ;;  %v3045_v5 = vpop.f32.mrb[168].mxu0 }
 0x5ff   :  { %v3046_v0 = vpop.f32.mrb[169].mxu0 }
 0x600   :  { %v3047_v6 = vadd.f32 %v3046_v0, %v3045_v5  ;;  %v3048_v7 = vpop.f32.mrb[170].mxu0 }
 0x601   :  { %v3049_v58 = vpop.f32.mrb[171].mxu0 }
 0x602   :  { %v3050_v8 = vadd.f32 %v3049_v58, %v3048_v7 }
 0x604   :  { %v1999_v55 = vpack.c.bf16 %v3050_v8, %v3047_v6 }
 0x606   :  { %v3051_v10 = vpop.f32.mrb[172].mxu0  ;;  %3405 = vmatprep.mubr.bf16.mxu1 %v1999_v55 }
 0x607   :  { %v3052_v12 = vpop.f32.mrb[173].mxu0 }
 0x608   :  { %v3053_v54 = vadd.f32 %v3052_v12, %v3051_v10  ;;  %v3054_v17 = vpop.f32.mrb[174].mxu0 }
 0x609   :  { %v3055_v11 = vpop.f32.mrb[175].mxu0 }
 0x60a   :  { %v3056_v18 = vadd.f32 %v3055_v11, %v3054_v17 }
 0x60c   :  { %v2000_v19 = vpack.c.bf16 %v3056_v18, %v3053_v54 }
 0x60e   :  { %3406 = vmatmul.mubr.bf16.gmra.mrb[84].mxu1 %v2000_v19  ;;  %v3057_v20 = vpop.f32.mrb[176].mxu0 }
 0x60f   :  { %v3058_v16 = vpop.f32.mrb[177].mxu0 }
 0x610   :  { %v3059_v21 = vadd.f32 %v3058_v16, %v3057_v20  ;;  %v3060_v25 = vpop.f32.mrb[178].mxu0 }
 0x611   :  { %v3061_v15 = vpop.f32.mrb[179].mxu0 }
 0x612   :  { %v3062_v27 = vadd.f32 %v3061_v15, %v3060_v25 }
 0x614   :  { %v2001_v14 = vpack.c.bf16 %v3062_v27, %v3059_v21 }
 0x616   :  { %v3063_v29 = vpop.f32.mrb[180].mxu0  ;;  %3409 = vmatprep.mubr.bf16.mxu1 %v2001_v14 }
 0x617   :  { %v3064_v23 = vpop.f32.mrb[181].mxu0 }
 0x618   :  { %v3065_v13 = vadd.f32 %v3064_v23, %v3063_v29  ;;  %v3066_v28 = vpop.f32.mrb[182].mxu0 }
 0x619   :  { %v3067_v30 = vpop.f32.mrb[183].mxu0 }
 0x61a   :  { %v3068_v34 = vadd.f32 %v3067_v30, %v3066_v28 }
 0x61c   :  { %v2002_v32 = vpack.c.bf16 %v3068_v34, %v3065_v13 }
 0x61e   :  { %3410 = vmatmul.mubr.bf16.gmra.mrb[88].mxu1 %v2002_v32  ;;  %v3069_v26 = vpop.f32.mrb[184].mxu0 }
 0x61f   :  { %v3070_v24 = vpop.f32.mrb[185].mxu0 }
 0x620   :  { %v3071_v36 = vadd.f32 %v3070_v24, %v3069_v26  ;;  %v3072_v9 = vpop.f32.mrb[186].mxu0 }
 0x621   :  { %v3073_v38 = vpop.f32.mrb[187].mxu0 }
 0x622   :  { %v3074_v31 = vadd.f32 %v3073_v38, %v3072_v9 }
 0x624   :  { %v2003_v40 = vpack.c.bf16 %v3074_v31, %v3071_v36 }
 0x626   :  { %v3075_v42 = vpop.f32.mrb[188].mxu0  ;;  %3413 = vmatprep.mubr.bf16.mxu1 %v2003_v40 }
 0x627   :  { %v3076_v39 = vpop.f32.mrb[189].mxu0 }
 0x628   :  { %v3077_v33 = vadd.f32 %v3076_v39, %v3075_v42  ;;  %v3078_v43 = vpop.f32.mrb[190].mxu0 }
 0x629   :  { %v3079_v44 = vpop.f32.mrb[191].mxu0 }
 0x62a   :  { %v3080_v45 = vadd.f32 %v3079_v44, %v3078_v43 }
 0x62c   :  { %v2004_v46 = vpack.c.bf16 %v3080_v45, %v3077_v33 }
 0x62e   :  { %3414 = vmatmul.mubr.bf16.gmra.mrb[92].mxu1 %v2004_v46 }
 0x691   :  { %v3387_v48 = vpop.f32.mrb[64].mxu1 }
 0x692   :  { %v2467_v49 = vadd.f32 %v3387_v48, %v4219_v47  ;;  %v2330_v50 = vpop.f32.mrb[65].mxu1 }
 0x693   :  { %v2465_v56 = vadd.f32 %v4219_v47, %v2330_v50  ;;  %v3388_v57 = vpop.f32.mrb[66].mxu1 }
 0x694   :  { %2499 = vst [vmem:[#allocation10 + $0x10] sm:$0xff] %v2467_v49  ;;  %v2468_v59 = vadd.f32 %v3388_v57, %v4219_v47  ;;  %v2333_v60 = vpop.f32.mrb[67].mxu1 }
 0x695   :  { %2497 = vst [vmem:[#allocation10] sm:$0xff] %v2465_v56  ;;  %v2466_v61 = vadd.f32 %v4219_v47, %v2333_v60 }
 0x696   :  { %2500 = vst [vmem:[#allocation10 + $0x18] sm:$0xff] %v2468_v59 }
 0x697   :  { %2498 = vst [vmem:[#allocation10 + $0x8] sm:$0xff] %v2466_v61 }
 0x6a1   :  { %v3391_v62 = vpop.f32.mrb[68].mxu1 }
 0x6a2   :  { %v2471_v63 = vadd.f32 %v3391_v62, %v4219_v47  ;;  %v2346_v37 = vpop.f32.mrb[69].mxu1 }
 0x6a3   :  { %v2469_v22 = vadd.f32 %v4219_v47, %v2346_v37  ;;  %v3392_v35 = vpop.f32.mrb[70].mxu1 }
 0x6a4   :  { %2503 = vst [vmem:[#allocation10 + $0x30] sm:$0xff] %v2471_v63  ;;  %v2472_v53 = vadd.f32 %v3392_v35, %v4219_v47  ;;  %v2349_v41 = vpop.f32.mrb[71].mxu1 }
 0x6a5   :  { %2501 = vst [vmem:[#allocation10 + $0x20] sm:$0xff] %v2469_v22  ;;  %v2470_v51 = vadd.f32 %v4219_v47, %v2349_v41 }
 0x6a6   :  { %2504 = vst [vmem:[#allocation10 + $0x38] sm:$0xff] %v2472_v53 }
 0x6a7   :  { %2502 = vst [vmem:[#allocation10 + $0x28] sm:$0xff] %v2470_v51 }
 0x6b1   :  { %v3395_v52 = vpop.f32.mrb[72].mxu1 }
 0x6b2   :  { %v2475_v1 = vadd.f32 %v3395_v52, %v4219_v47  ;;  %v2362_v2 = vpop.f32.mrb[73].mxu1 }
 0x6b3   :  { %v2473_v3 = vadd.f32 %v4219_v47, %v2362_v2  ;;  %v3396_v4 = vpop.f32.mrb[74].mxu1 }
 0x6b4   :  { %2507 = vst [vmem:[#allocation10 + $0x50] sm:$0xff] %v2475_v1  ;;  %v2476_v5 = vadd.f32 %v3396_v4, %v4219_v47  ;;  %v2365_v0 = vpop.f32.mrb[75].mxu1 }
 0x6b5   :  { %2505 = vst [vmem:[#allocation10 + $0x40] sm:$0xff] %v2473_v3  ;;  %v2474_v6 = vadd.f32 %v4219_v47, %v2365_v0 }
 0x6b6   :  { %2508 = vst [vmem:[#allocation10 + $0x58] sm:$0xff] %v2476_v5 }
 0x6b7   :  { %2506 = vst [vmem:[#allocation10 + $0x48] sm:$0xff] %v2474_v6 }
 0x6c1   :  { %v3399_v7 = vpop.f32.mrb[76].mxu1 }
 0x6c2   :  { %v2479_v58 = vadd.f32 %v3399_v7, %v4219_v47  ;;  %v2378_v8 = vpop.f32.mrb[77].mxu1 }
 0x6c3   :  { %v2477_v55 = vadd.f32 %v4219_v47, %v2378_v8  ;;  %v3400_v10 = vpop.f32.mrb[78].mxu1 }
 0x6c4   :  { %2511 = vst [vmem:[#allocation10 + $0x70] sm:$0xff] %v2479_v58  ;;  %v2480_v12 = vadd.f32 %v3400_v10, %v4219_v47  ;;  %v2381_v54 = vpop.f32.mrb[79].mxu1 }
 0x6c5   :  { %2509 = vst [vmem:[#allocation10 + $0x60] sm:$0xff] %v2477_v55  ;;  %v2478_v17 = vadd.f32 %v4219_v47, %v2381_v54 }
 0x6c6   :  { %2512 = vst [vmem:[#allocation10 + $0x78] sm:$0xff] %v2480_v12 }
 0x6c7   :  { %2510 = vst [vmem:[#allocation10 + $0x68] sm:$0xff] %v2478_v17 }
 0x6d1   :  { %v3403_v11 = vpop.f32.mrb[80].mxu1 }
 0x6d2   :  { %v2483_v18 = vadd.f32 %v3403_v11, %v4219_v47  ;;  %v2394_v19 = vpop.f32.mrb[81].mxu1 }
 0x6d3   :  { %v2481_v20 = vadd.f32 %v4219_v47, %v2394_v19  ;;  %v3404_v16 = vpop.f32.mrb[82].mxu1 }
 0x6d4   :  { %2515 = vst [vmem:[#allocation10 + $0x90] sm:$0xff] %v2483_v18  ;;  %v2484_v21 = vadd.f32 %v3404_v16, %v4219_v47  ;;  %v2397_v25 = vpop.f32.mrb[83].mxu1 }
 0x6d5   :  { %2513 = vst [vmem:[#allocation10 + $0x80] sm:$0xff] %v2481_v20  ;;  %v2482_v15 = vadd.f32 %v4219_v47, %v2397_v25 }
 0x6d6   :  { %2516 = vst [vmem:[#allocation10 + $0x98] sm:$0xff] %v2484_v21 }
 0x6d7   :  { %2514 = vst [vmem:[#allocation10 + $0x88] sm:$0xff] %v2482_v15 }
 0x6e1   :  { %v3407_v27 = vpop.f32.mrb[84].mxu1 }
 0x6e2   :  { %v2487_v14 = vadd.f32 %v3407_v27, %v4219_v47  ;;  %v2410_v29 = vpop.f32.mrb[85].mxu1 }
 0x6e3   :  { %v2485_v23 = vadd.f32 %v4219_v47, %v2410_v29  ;;  %v3408_v13 = vpop.f32.mrb[86].mxu1 }
 0x6e4   :  { %2519 = vst [vmem:[#allocation10 + $0xb0] sm:$0xff] %v2487_v14  ;;  %v2488_v28 = vadd.f32 %v3408_v13, %v4219_v47  ;;  %v2413_v30 = vpop.f32.mrb[87].mxu1 }
 0x6e5   :  { %2517 = vst [vmem:[#allocation10 + $0xa0] sm:$0xff] %v2485_v23  ;;  %v2486_v34 = vadd.f32 %v4219_v47, %v2413_v30 }
 0x6e6   :  { %2520 = vst [vmem:[#allocation10 + $0xb8] sm:$0xff] %v2488_v28 }
 0x6e7   :  { %2518 = vst [vmem:[#allocation10 + $0xa8] sm:$0xff] %v2486_v34 }
 0x6f1   :  { %v3411_v32 = vpop.f32.mrb[88].mxu1 }
 0x6f2   :  { %v2491_v26 = vadd.f32 %v3411_v32, %v4219_v47  ;;  %v2426_v24 = vpop.f32.mrb[89].mxu1 }
 0x6f3   :  { %v2489_v36 = vadd.f32 %v4219_v47, %v2426_v24  ;;  %v3412_v9 = vpop.f32.mrb[90].mxu1 }
 0x6f4   :  { %2523 = vst [vmem:[#allocation10 + $0xd0] sm:$0xff] %v2491_v26  ;;  %v2492_v38 = vadd.f32 %v3412_v9, %v4219_v47  ;;  %v2429_v31 = vpop.f32.mrb[91].mxu1 }
 0x6f5   :  { %2521 = vst [vmem:[#allocation10 + $0xc0] sm:$0xff] %v2489_v36  ;;  %v2490_v40 = vadd.f32 %v4219_v47, %v2429_v31 }
 0x6f6   :  { %2524 = vst [vmem:[#allocation10 + $0xd8] sm:$0xff] %v2492_v38 }
 0x6f7   :  { %2522 = vst [vmem:[#allocation10 + $0xc8] sm:$0xff] %v2490_v40 }
 0x701   :  { %v3415_v42 = vpop.f32.mrb[92].mxu1 }
 0x702   :  { %v2495_v39 = vadd.f32 %v3415_v42, %v4219_v47  ;;  %v2442_v33 = vpop.f32.mrb[93].mxu1 }
 0x703   :  { %v2493_v43 = vadd.f32 %v4219_v47, %v2442_v33  ;;  %v3416_v44 = vpop.f32.mrb[94].mxu1 }
 0x704   :  { %2527 = vst [vmem:[#allocation10 + $0xf0] sm:$0xff] %v2495_v39  ;;  %v2496_v45 = vadd.f32 %v3416_v44, %v4219_v47  ;;  %v2445_v46 = vpop.f32.mrb[95].mxu1 }
 0x705   :  { %2525 = vst [vmem:[#allocation10 + $0xe0] sm:$0xff] %v2493_v43  ;;  %v2494_v48 = vadd.f32 %v4219_v47, %v2445_v46 }
 0x706   :  { %2528 = vst [vmem:[#allocation10 + $0xf8] sm:$0xff] %v2496_v45 }
 0x707   :  { %2526 = vst [vmem:[#allocation10 + $0xe8] sm:$0xff] %v2494_v48 }
 0x708   :  { %3765 = shalt.err (!%p3762_p8)
}
 0x709   :  { %s3766_s27 = scalar_lea.hbm %s4273_s5, 4096 }
 0x70a   :  { %p3767_p9 = scmp.ne.s32.totalorder %s4273_s5, %s3766_s27  ;;  %p3770_p10 = scmp.lt.u32.totalorder %s3766_s27, %s4273_s5 }
 0x70c   :  { %p3772_p11 = pnand %p3770_p10, %p3767_p9 }
 0x70e   :  { %3775 = shalt.err (!%p3772_p11)
}
 0x70f   :  { %2540 = dma.vmem_to_hbm [thread:$0]  %s2535_s23, 4096, %s4273_s5, [#allocation4], %s3788_s1, %s3788_s1, %s3789_s17  }
 0x710   :  { %3782 = dma.done.wait [#allocation4], 4096  }
 0x711   :  { %3783 = vsyncadd [#allocation4], 4294963200 }
 0x712   :  { %2544 = vsyncpa [#allocation3], 1 }
 0x713   :  { %2545 = vsyncpa [#allocation6], 1 }
 0x714   :  { %2546 = vsyncpa [#allocation9], 1 }
 0x715   :  { %2547 = vsyncpa [#allocation4], 1 }

</bundles_post_ra>
